<compile_context>
chip_gen: v6e
topology: v6e:2x2x1
jax: 0.10.0
libtpu: 0.0.40
codegen_flags: <defaults>
</compile_context>

<pallas_src>
import functools

import jax
import jax.numpy as jnp
from jax import lax
from jax.experimental import pallas as pl
from jax.experimental.pallas import tpu as pltpu


def _round_up(n, m):
    return ((n + m - 1) // m) * m


def _gate_lane_multiple(hidden_size):
    """Pad the recurrent K dim to 256 on v6e/v7x (256x256 MXU) when H >= 256."""
    if hidden_size < 256:
        return 128
    try:
        kind = jax.devices()[0].device_kind.lower()
        if "v5" in kind:          # v5e MXU is 128x128 — 128 already saturates K
            return 128
    except Exception:
        pass
    return 256


def _pick_batch_block(batch):
    """Split batch across grid blocks (megacore on v7x) only when each block keeps a
    full MXU M-tile (>=128 rows); otherwise keep the whole batch in one block."""
    if batch >= 256 and batch % 128 == 0:
        return 128
    return batch


def _pick_time_chunk(seq_len, bb, ip, hp, budget_bytes=24 << 20):
    """Largest divisor of seq_len whose per-chunk VMEM footprint fits the budget
    (sized for v7x's 64 MiB physical VMEM: 2x double-buffered I/O + gi scratch)."""
    fixed = (ip * 3 * hp + hp * 3 * hp) * 2 * 2 + bb * hp * 4   # weights (x2 buf) + h

    def per_chunk(t):
        io = t * bb * (2 * ip + hp) * 2          # x + mask + out chunk, bf16
        gi = t * bb * 3 * hp * 4                 # f32 projection scratch
        return 2 * io + gi                       # I/O chunks are double-buffered

    for t in range(seq_len, 0, -1):
        if seq_len % t == 0 and fixed + per_chunk(t) <= budget_bytes:
            return t
    return 1


def gru_layer_kernel(x_ref, m_ref, wih_ref, whh_ref, brz_ref, bhhn_ref,
                     out_ref, gi_ref, h_ref, *, hidden_pad, unroll):
    """One (batch-block, time-chunk) grid step of a GRU layer.

    x_ref   : [T, Bb, Ip]   bf16 layer input chunk
    m_ref   : [T, Bb, Ip]   bf16 dropout keep/scale mask (ones when dropout is off)
    wih_ref : [Ip, 3*Hp]    bf16, gate order r|z|n, each gate lane-padded to Hp
    whh_ref : [Hp, 3*Hp]    bf16
    brz_ref : [1, 3*Hp]     f32, b_ih (all gates) + b_hh (r,z gates only)
    bhhn_ref: [1, Hp]       f32, b_hh for the n gate (stays inside r*(...))
    out_ref : [T, Bb, Hp]   bf16 hidden states for this chunk
    gi_ref  : VMEM scratch [T, Bb, 3*Hp] f32 — hoisted input projection for the chunk
    h_ref   : VMEM scratch [Bb, Hp] f32 — hidden state carried across time chunks
    """
    Hp = hidden_pad
    T, Bb, Ip = x_ref.shape

    # Reset the carried hidden state at the first time chunk of each batch block.
    @pl.when(pl.program_id(1) == 0)
    def _():
        h_ref[...] = jnp.zeros_like(h_ref)

    # Hoisted input projection for the whole chunk (dropout fused via the mask multiply):
    # one fat [T*Bb, Ip] @ [Ip, 3Hp] MXU matmul, result parked in VMEM scratch.
    x = (x_ref[...] * m_ref[...]).reshape(T * Bb, Ip)                     # bf16
    gi = jnp.dot(x, wih_ref[...], preferred_element_type=jnp.float32)     # [T*Bb, 3Hp]
    gi_ref[...] = gi.reshape(T, Bb, 3 * Hp) + brz_ref[...]                # biases folded once

    # Hoist the n-gate bias broadcast out of the loop (JAX does not CSE broadcasts).
    bhh_n = jnp.broadcast_to(bhhn_ref[...], (Bb, Hp))

    def step(t, h):
        gi_t = gi_ref[t]                                                  # [Bb, 3Hp] scratch read
        # TODO(synk): pltpu.matmul_push_rhs to keep W_hh resident in MXU weight regs
        #             across the whole recurrence (removes the per-step weight push).
        gh = jnp.dot(h.astype(jnp.bfloat16), whh_ref[...],
                     preferred_element_type=jnp.float32)                  # [Bb, 3Hp]
        # Lane-aligned gate slices (Hp is a multiple of 128).
        r = jax.nn.sigmoid(gi_t[:, 0:Hp] + gh[:, 0:Hp])
        z = jax.nn.sigmoid(gi_t[:, Hp:2 * Hp] + gh[:, Hp:2 * Hp])
        n = jnp.tanh(gi_t[:, 2 * Hp:3 * Hp] + r * (gh[:, 2 * Hp:3 * Hp] + bhh_n))
        h_new = (1.0 - z) * n + z * h
        out_ref[t] = h_new.astype(out_ref.dtype)
        return h_new

    h_ref[...] = lax.fori_loop(0, T, step, h_ref[...], unroll=unroll)


def gru_layer(x_bf16, mask_bf16, wih, whh, brz, bhh_n, *, hidden_pad):
    """Run one GRU layer over the sequence with a (batch, time-chunk) Pallas grid.

    x_bf16, mask_bf16: [S, B, Ip] bf16  ->  returns [S, B, Hp] bf16 (padded lanes zero).
    """
    S, B, Ip = x_bf16.shape
    Hp = hidden_pad
    Bb = _pick_batch_block(B)
    T = _pick_time_chunk(S, Bb, Ip, Hp)
    unroll = True if T <= 16 else 8          # partial unroll for long chunks

    kernel = functools.partial(gru_layer_kernel, hidden_pad=Hp, unroll=unroll)

    return pl.pallas_call(
        kernel,
        out_shape=jax.ShapeDtypeStruct((S, B, Hp), jnp.bfloat16),
        grid_spec=pltpu.PrefetchScalarGridSpec(
            num_scalar_prefetch=0,
            grid=(B // Bb, S // T),
            in_specs=[
                pl.BlockSpec((T, Bb, Ip), lambda b, t: (t, b, 0)),        # x chunk
                pl.BlockSpec((T, Bb, Ip), lambda b, t: (t, b, 0)),        # dropout mask
                pl.BlockSpec((Ip, 3 * Hp), lambda b, t: (0, 0)),          # W_ih
                pl.BlockSpec((Hp, 3 * Hp), lambda b, t: (0, 0)),          # W_hh
                pl.BlockSpec((1, 3 * Hp), lambda b, t: (0, 0)),           # folded r/z/n biases
                pl.BlockSpec((1, Hp), lambda b, t: (0, 0)),               # n-gate b_hh
            ],
            out_specs=pl.BlockSpec((T, Bb, Hp), lambda b, t: (t, b, 0)),
            scratch_shapes=[
                pltpu.VMEM((T, Bb, 3 * Hp), jnp.float32),                 # gi chunk scratch
                pltpu.VMEM((Bb, Hp), jnp.float32),                        # carried hidden state
            ],
        ),
        compiler_params=pltpu.CompilerParams(
            dimension_semantics=("parallel", "arbitrary"),                # batch || , time serial
            vmem_limit_bytes=48 * 1024 * 1024,                            # explicit (v5e default 16 MiB)
        ),
    )(x_bf16, mask_bf16, wih, whh, brz, bhh_n)


class BaseRNNPallas:
    """JAX/Pallas analog of BaseRNN: input dropout + n_layers of the rnn_cell (GRU)."""

    SYM_MASK = 'MASK'
    SYM_EOS = 'EOS'

    def __init__(self, vocab_size, max_len, hidden_size, input_dropout_p,
                 dropout_p, n_layers, rnn_cell, input_size=None, key=None):
        assert rnn_cell.upper() == 'GRU', "only the GRU rnn_cell is implemented"
        self.vocab_size = vocab_size
        self.max_len = max_len
        self.hidden_size = hidden_size
        self.n_layers = n_layers
        self.input_dropout_p = input_dropout_p
        self.dropout_p = dropout_p
        self.input_size = hidden_size if input_size is None else input_size

        if key is None:
            key = jax.random.PRNGKey(0)

        H = hidden_size
        lane = _gate_lane_multiple(H)
        Hp = _round_up(H, lane)             # lane-dense padded hidden size
        self.hidden_pad = Hp
        bound = 1.0 / (H ** 0.5)            # PyTorch RNN default init: U(-1/sqrt(H), 1/sqrt(H))

        self.layers = []
        in_sz = self.input_size
        for _ in range(n_layers):
            Ip = _round_up(in_sz, 128)
            key, k1, k2, k3, k4 = jax.random.split(key, 5)
            w_ih = jax.random.uniform(k1, (in_sz, 3 * H), jnp.float32, -bound, bound)
            w_hh = jax.random.uniform(k2, (H, 3 * H), jnp.float32, -bound, bound)
            b_ih = jax.random.uniform(k3, (3 * H,), jnp.float32, -bound, bound)
            b_hh = jax.random.uniform(k4, (3 * H,), jnp.float32, -bound, bound)

            # Pad to the lane-dense gate layout [.., 3*Hp]; gate g occupies [g*Hp, g*Hp+H).
            wih_pad = jnp.zeros((Ip, 3 * Hp), jnp.float32)
            whh_pad = jnp.zeros((Hp, 3 * Hp), jnp.float32)
            brz = jnp.zeros((1, 3 * Hp), jnp.float32)
            for g in range(3):
                wih_pad = wih_pad.at[:in_sz, g * Hp:g * Hp + H].set(
                    w_ih[:, g * H:(g + 1) * H])
                whh_pad = whh_pad.at[:H, g * Hp:g * Hp + H].set(
                    w_hh[:, g * H:(g + 1) * H])
                bias_g = b_ih[g * H:(g + 1) * H]
                if g < 2:   # r, z: b_hh folds into the hoisted input projection
                    bias_g = bias_g + b_hh[g * H:(g + 1) * H]
                brz = brz.at[0, g * Hp:g * Hp + H].set(bias_g)
            bhh_n = jnp.zeros((1, Hp), jnp.float32).at[0, :H].set(b_hh[2 * H:3 * H])

            self.layers.append(dict(
                wih=wih_pad.astype(jnp.bfloat16),   # bf16 MXU inputs
                whh=whh_pad.astype(jnp.bfloat16),
                brz=brz,
                bhh_n=bhh_n,
                in_pad=Ip))
            in_sz = H

    def forward(self, x, seed=0, training=True):
        """x: [S, B, input_size] -> [S, B, hidden_size]."""
        Hp = self.hidden_pad
        key = jax.random.PRNGKey(seed)

        out = x.astype(jnp.bfloat16)
        pad0 = self.layers[0]['in_pad'] - out.shape[-1]
        if pad0:
            out = jnp.pad(out, ((0, 0), (0, 0), (0, pad0)))   # lane-dense first-layer input

        for layer_idx, p in enumerate(self.layers):
            # BaseRNN's input_dropout is applied to the rnn input (layer 0);
            # dropout_p is the inter-layer dropout of the stacked rnn_cell.
            drop_p = self.input_dropout_p if layer_idx == 0 else self.dropout_p
            if training and drop_p > 0.0:
                key, sub = jax.random.split(key)
                keep = jax.random.bernoulli(sub, 1.0 - drop_p, out.shape)
                mask = jnp.where(keep, 1.0 / (1.0 - drop_p), 0.0).astype(jnp.bfloat16)
            else:
                mask = jnp.ones(out.shape, jnp.bfloat16)
            out = gru_layer(out, mask, p['wih'], p['whh'], p['brz'], p['bhh_n'],
                            hidden_pad=Hp)
            # out is [S, B, Hp] bf16; next layer's Ip == Hp, so no re-pad is needed.
        return out[:, :, :self.hidden_size].astype(x.dtype)


if __name__ == "__main__":
    # Small shapes implied by the module: seq = max_len = 8, batch = 8, hidden = 32.
    vocab_size = 50          # stored but unused by BaseRNN itself (no embedding defined)
    max_len = 8
    hidden_size = 32
    batch = 8
    n_layers = 2

    root = jax.random.PRNGKey(0)
    k_param, k_x = jax.random.split(root)

    model = BaseRNNPallas(vocab_size, max_len, hidden_size,
                          input_dropout_p=0.25, dropout_p=0.2,
                          n_layers=n_layers, rnn_cell='gru',
                          key=k_param)

    x = jax.random.normal(k_x, (max_len, batch, hidden_size), jnp.float32)

    out = model.forward(x, seed=42)
    out = jax.block_until_ready(out)

    assert out.shape == (max_len, batch, hidden_size)
    assert bool(jnp.all(jnp.isfinite(out)))
    print("KERNEL_OK")
</pallas_src>

<mosaic_0001>
module attributes {stable_mosaic.version = 11 : i64} {
  func.func @gru_layer_kernel(%arg0: i32, %arg1: i32, %arg2: memref<8x8x128xbf16, #tpu.memory_space<vmem>>, %arg3: memref<8x8x128xbf16, #tpu.memory_space<vmem>>, %arg4: memref<128x384xbf16, #tpu.memory_space<vmem>>, %arg5: memref<128x384xbf16, #tpu.memory_space<vmem>>, %arg6: memref<1x384xf32, #tpu.memory_space<vmem>>, %arg7: memref<1x128xf32, #tpu.memory_space<vmem>>, %arg8: memref<8x8x128xbf16, #tpu.memory_space<vmem>>, %arg9: memref<8x8x384xf32, #tpu.memory_space<vmem>>, %arg10: memref<8x128xf32, #tpu.memory_space<vmem>>) attributes {dimension_semantics = [#tpu.dimension_semantics<parallel>, #tpu.dimension_semantics<arbitrary>], iteration_bounds = array<i64: 1, 1>, scalar_prefetch = 0 : i64, scratch_operands = 2 : i64, tpu.core_type = #tpu.core_type<tc>, window_params = [{transform_indices = @transform_0, window_bounds = array<i64: 8, 8, 128>}, {transform_indices = @transform_1, window_bounds = array<i64: 8, 8, 128>}, {pipeline_mode = #tpu.pipeline_mode<synchronous>, transform_indices = @transform_2, window_bounds = array<i64: 128, 384>}, {pipeline_mode = #tpu.pipeline_mode<synchronous>, transform_indices = @transform_3, window_bounds = array<i64: 128, 384>}, {pipeline_mode = #tpu.pipeline_mode<synchronous>, transform_indices = @transform_4, window_bounds = array<i64: 1, 384>}, {pipeline_mode = #tpu.pipeline_mode<synchronous>, transform_indices = @transform_5, window_bounds = array<i64: 1, 128>}, {transform_indices = @transform_6, window_bounds = array<i64: 8, 8, 128>}]} {
    %c0_i32 = arith.constant 0 : i32
    %0 = arith.cmpi eq, %arg1, %c0_i32 : i32
    %1 = arith.extui %0 : i1 to i32
    %c0_i32_0 = arith.constant 0 : i32
    %2 = arith.cmpi ne, %1, %c0_i32_0 : i32
    scf.if %2 {
      %cst_100 = arith.constant 0.000000e+00 : f32
      %324 = vector.broadcast %cst_100 : f32 to vector<8x128xf32>
      %c0_101 = arith.constant 0 : index
      %c0_102 = arith.constant 0 : index
      %325 = vector.load %arg10[%c0_101, %c0_102] : memref<8x128xf32, #tpu.memory_space<vmem>>, vector<8x128xf32>
      tpu.vector_store %arg10[%c0_101, %c0_102], %324 {strides = array<i32>} : memref<8x128xf32, #tpu.memory_space<vmem>>, vector<8x128xf32>,
    } else {
    }
    %c0 = arith.constant 0 : index
    %c0_1 = arith.constant 0 : index
    %c0_2 = arith.constant 0 : index
    %3 = vector.load %arg2[%c0, %c0_1, %c0_2] : memref<8x8x128xbf16, #tpu.memory_space<vmem>>, vector<8x8x128xbf16>
    %c0_3 = arith.constant 0 : index
    %c0_4 = arith.constant 0 : index
    %c0_5 = arith.constant 0 : index
    %4 = vector.load %arg3[%c0_3, %c0_4, %c0_5] : memref<8x8x128xbf16, #tpu.memory_space<vmem>>, vector<8x8x128xbf16>
    %5 = arith.mulf %3, %4 : vector<8x8x128xbf16>
    %6 = vector.shape_cast %5 : vector<8x8x128xbf16> to vector<64x128xbf16>
    %c0_6 = arith.constant 0 : index
    %c0_7 = arith.constant 0 : index
    %7 = vector.load %arg4[%c0_6, %c0_7] : memref<128x384xbf16, #tpu.memory_space<vmem>>, vector<128x384xbf16>
    %cst = arith.constant dense<0.000000e+00> : vector<64x384xf32>
    %8 = tpu.matmul %6, %7, %cst {dimension_numbers = #tpu.dot_dimension_numbers<[1], [0], [0], [1], [0, 0, 1, 1], [], []>} : vector<64x128xbf16>, vector<128x384xbf16>, vector<64x384xf32> -> vector<64x384xf32>
    %9 = vector.shape_cast %8 : vector<64x384xf32> to vector<8x8x384xf32>
    %c0_8 = arith.constant 0 : index
    %c0_9 = arith.constant 0 : index
    %10 = vector.load %arg6[%c0_8, %c0_9] : memref<1x384xf32, #tpu.memory_space<vmem>>, vector<1x384xf32>
    %11 = vector.shape_cast %10 : vector<1x384xf32> to vector<1x1x384xf32>
    %12 = vector.broadcast %11 : vector<1x1x384xf32> to vector<8x8x384xf32>
    %13 = arith.addf %9, %12 : vector<8x8x384xf32>
    %c0_10 = arith.constant 0 : index
    %c0_11 = arith.constant 0 : index
    %c0_12 = arith.constant 0 : index
    %14 = vector.load %arg9[%c0_10, %c0_11, %c0_12] : memref<8x8x384xf32, #tpu.memory_space<vmem>>, vector<8x8x384xf32>
    tpu.vector_store %arg9[%c0_10, %c0_11, %c0_12], %13 {strides = array<i32>} : memref<8x8x384xf32, #tpu.memory_space<vmem>>, vector<8x8x384xf32>,
    %c0_13 = arith.constant 0 : index
    %c0_14 = arith.constant 0 : index
    %15 = vector.load %arg7[%c0_13, %c0_14] : memref<1x128xf32, #tpu.memory_space<vmem>>, vector<1x128xf32>
    %16 = vector.shape_cast %15 : vector<1x128xf32> to vector<1x128xf32>
    %17 = vector.broadcast %16 : vector<1x128xf32> to vector<8x128xf32>
    %c0_15 = arith.constant 0 : index
    %c0_16 = arith.constant 0 : index
    %18 = vector.load %arg10[%c0_15, %c0_16] : memref<8x128xf32, #tpu.memory_space<vmem>>, vector<8x128xf32>
    %c0_i32_17 = arith.constant 0 : i32
    %19 = arith.index_cast %c0_i32_17 : i32 to index
    %c0_18 = arith.constant 0 : index
    %c0_19 = arith.constant 0 : index
    %20 = vector.load %arg9[%19, %c0_18, %c0_19] : memref<8x8x384xf32, #tpu.memory_space<vmem>>, vector<1x8x384xf32>
    %21 = vector.shape_cast %20 : vector<1x8x384xf32> to vector<8x384xf32>
    %22 = arith.truncf %18 : vector<8x128xf32> to vector<8x128xbf16>
    %c0_20 = arith.constant 0 : index
    %c0_21 = arith.constant 0 : index
    %23 = vector.load %arg5[%c0_20, %c0_21] : memref<128x384xbf16, #tpu.memory_space<vmem>>, vector<128x384xbf16>
    %cst_22 = arith.constant dense<0.000000e+00> : vector<8x384xf32>
    %24 = tpu.matmul %22, %23, %cst_22 {dimension_numbers = #tpu.dot_dimension_numbers<[1], [0], [0], [1], [0, 0, 1, 1], [], []>} : vector<8x128xbf16>, vector<128x384xbf16>, vector<8x384xf32> -> vector<8x384xf32>
    %25 = vector.extract_strided_slice %21 {offsets = [0, 0], sizes = [8, 128], strides = [1, 1]} : vector<8x384xf32> to vector<8x128xf32>
    %26 = vector.extract_strided_slice %24 {offsets = [0, 0], sizes = [8, 128], strides = [1, 1]} : vector<8x384xf32> to vector<8x128xf32>
    %27 = arith.addf %25, %26 : vector<8x128xf32>
    %28 = arith.negf %27 : vector<8x128xf32>
    %29 = math.exp %28 : vector<8x128xf32>
    %cst_23 = arith.constant 1.000000e+00 : f32
    %30 = vector.broadcast %cst_23 : f32 to vector<8x128xf32>
    %31 = arith.addf %30, %29 : vector<8x128xf32>
    %32 = arith.divf %30, %31 : vector<8x128xf32>
    %33 = vector.extract_strided_slice %21 {offsets = [0, 128], sizes = [8, 128], strides = [1, 1]} : vector<8x384xf32> to vector<8x128xf32>
    %34 = vector.extract_strided_slice %24 {offsets = [0, 128], sizes = [8, 128], strides = [1, 1]} : vector<8x384xf32> to vector<8x128xf32>
    %35 = arith.addf %33, %34 : vector<8x128xf32>
    %36 = arith.negf %35 : vector<8x128xf32>
    %37 = math.exp %36 : vector<8x128xf32>
    %cst_24 = arith.constant 1.000000e+00 : f32
    %38 = vector.broadcast %cst_24 : f32 to vector<8x128xf32>
    %39 = arith.addf %38, %37 : vector<8x128xf32>
    %40 = arith.divf %38, %39 : vector<8x128xf32>
    %41 = vector.extract_strided_slice %21 {offsets = [0, 256], sizes = [8, 128], strides = [1, 1]} : vector<8x384xf32> to vector<8x128xf32>
    %42 = vector.extract_strided_slice %24 {offsets = [0, 256], sizes = [8, 128], strides = [1, 1]} : vector<8x384xf32> to vector<8x128xf32>
    %43 = arith.addf %42, %17 : vector<8x128xf32>
    %44 = arith.mulf %32, %43 : vector<8x128xf32>
    %45 = arith.addf %41, %44 : vector<8x128xf32>
    %46 = math.tanh %45 : vector<8x128xf32>
    %cst_25 = arith.constant 1.000000e+00 : f32
    %47 = vector.broadcast %cst_25 : f32 to vector<8x128xf32>
    %48 = arith.subf %47, %40 : vector<8x128xf32>
    %49 = arith.mulf %48, %46 : vector<8x128xf32>
    %50 = arith.mulf %40, %18 : vector<8x128xf32>
    %51 = arith.addf %49, %50 : vector<8x128xf32>
    %52 = arith.truncf %51 : vector<8x128xf32> to vector<8x128xbf16>
    %53 = arith.index_cast %c0_i32_17 : i32 to index
    %c0_26 = arith.constant 0 : index
    %c0_27 = arith.constant 0 : index
    %54 = vector.load %arg8[%53, %c0_26, %c0_27] : memref<8x8x128xbf16, #tpu.memory_space<vmem>>, vector<1x8x128xbf16>
    %55 = vector.shape_cast %54 : vector<1x8x128xbf16> to vector<8x128xbf16>
    %56 = vector.shape_cast %52 : vector<8x128xbf16> to vector<1x8x128xbf16>
    tpu.vector_store %arg8[%53, %c0_26, %c0_27], %56 {strides = array<i32>} : memref<8x8x128xbf16, #tpu.memory_space<vmem>>, vector<1x8x128xbf16>,
    %c1_i32 = arith.constant 1 : i32
    %57 = arith.index_cast %c1_i32 : i32 to index
    %c0_28 = arith.constant 0 : index
    %c0_29 = arith.constant 0 : index
    %58 = vector.load %arg9[%57, %c0_28, %c0_29] : memref<8x8x384xf32, #tpu.memory_space<vmem>>, vector<1x8x384xf32>
    %59 = vector.shape_cast %58 : vector<1x8x384xf32> to vector<8x384xf32>
    %60 = arith.truncf %51 : vector<8x128xf32> to vector<8x128xbf16>
    %c0_30 = arith.constant 0 : index
    %c0_31 = arith.constant 0 : index
    %61 = vector.load %arg5[%c0_30, %c0_31] : memref<128x384xbf16, #tpu.memory_space<vmem>>, vector<128x384xbf16>
    %cst_32 = arith.constant dense<0.000000e+00> : vector<8x384xf32>
    %62 = tpu.matmul %60, %61, %cst_32 {dimension_numbers = #tpu.dot_dimension_numbers<[1], [0], [0], [1], [0, 0, 1, 1], [], []>} : vector<8x128xbf16>, vector<128x384xbf16>, vector<8x384xf32> -> vector<8x384xf32>
    %63 = vector.extract_strided_slice %59 {offsets = [0, 0], sizes = [8, 128], strides = [1, 1]} : vector<8x384xf32> to vector<8x128xf32>
    %64 = vector.extract_strided_slice %62 {offsets = [0, 0], sizes = [8, 128], strides = [1, 1]} : vector<8x384xf32> to vector<8x128xf32>
    %65 = arith.addf %63, %64 : vector<8x128xf32>
    %66 = arith.negf %65 : vector<8x128xf32>
    %67 = math.exp %66 : vector<8x128xf32>
    %cst_33 = arith.constant 1.000000e+00 : f32
    %68 = vector.broadcast %cst_33 : f32 to vector<8x128xf32>
    %69 = arith.addf %68, %67 : vector<8x128xf32>
    %70 = arith.divf %68, %69 : vector<8x128xf32>
    %71 = vector.extract_strided_slice %59 {offsets = [0, 128], sizes = [8, 128], strides = [1, 1]} : vector<8x384xf32> to vector<8x128xf32>
    %72 = vector.extract_strided_slice %62 {offsets = [0, 128], sizes = [8, 128], strides = [1, 1]} : vector<8x384xf32> to vector<8x128xf32>
    %73 = arith.addf %71, %72 : vector<8x128xf32>
    %74 = arith.negf %73 : vector<8x128xf32>
    %75 = math.exp %74 : vector<8x128xf32>
    %cst_34 = arith.constant 1.000000e+00 : f32
    %76 = vector.broadcast %cst_34 : f32 to vector<8x128xf32>
    %77 = arith.addf %76, %75 : vector<8x128xf32>
    %78 = arith.divf %76, %77 : vector<8x128xf32>
    %79 = vector.extract_strided_slice %59 {offsets = [0, 256], sizes = [8, 128], strides = [1, 1]} : vector<8x384xf32> to vector<8x128xf32>
    %80 = vector.extract_strided_slice %62 {offsets = [0, 256], sizes = [8, 128], strides = [1, 1]} : vector<8x384xf32> to vector<8x128xf32>
    %81 = arith.addf %80, %17 : vector<8x128xf32>
    %82 = arith.mulf %70, %81 : vector<8x128xf32>
    %83 = arith.addf %79, %82 : vector<8x128xf32>
    %84 = math.tanh %83 : vector<8x128xf32>
    %cst_35 = arith.constant 1.000000e+00 : f32
    %85 = vector.broadcast %cst_35 : f32 to vector<8x128xf32>
    %86 = arith.subf %85, %78 : vector<8x128xf32>
    %87 = arith.mulf %86, %84 : vector<8x128xf32>
    %88 = arith.mulf %78, %51 : vector<8x128xf32>
    %89 = arith.addf %87, %88 : vector<8x128xf32>
    %90 = arith.truncf %89 : vector<8x128xf32> to vector<8x128xbf16>
    %91 = arith.index_cast %c1_i32 : i32 to index
    %c0_36 = arith.constant 0 : index
    %c0_37 = arith.constant 0 : index
    %92 = vector.load %arg8[%91, %c0_36, %c0_37] : memref<8x8x128xbf16, #tpu.memory_space<vmem>>, vector<1x8x128xbf16>
    %93 = vector.shape_cast %92 : vector<1x8x128xbf16> to vector<8x128xbf16>
    %94 = vector.shape_cast %90 : vector<8x128xbf16> to vector<1x8x128xbf16>
    tpu.vector_store %arg8[%91, %c0_36, %c0_37], %94 {strides = array<i32>} : memref<8x8x128xbf16, #tpu.memory_space<vmem>>, vector<1x8x128xbf16>,
    %c2_i32 = arith.constant 2 : i32
    %95 = arith.index_cast %c2_i32 : i32 to index
    %c0_38 = arith.constant 0 : index
    %c0_39 = arith.constant 0 : index
    %96 = vector.load %arg9[%95, %c0_38, %c0_39] : memref<8x8x384xf32, #tpu.memory_space<vmem>>, vector<1x8x384xf32>
    %97 = vector.shape_cast %96 : vector<1x8x384xf32> to vector<8x384xf32>
    %98 = arith.truncf %89 : vector<8x128xf32> to vector<8x128xbf16>
    %c0_40 = arith.constant 0 : index
    %c0_41 = arith.constant 0 : index
    %99 = vector.load %arg5[%c0_40, %c0_41] : memref<128x384xbf16, #tpu.memory_space<vmem>>, vector<128x384xbf16>
    %cst_42 = arith.constant dense<0.000000e+00> : vector<8x384xf32>
    %100 = tpu.matmul %98, %99, %cst_42 {dimension_numbers = #tpu.dot_dimension_numbers<[1], [0], [0], [1], [0, 0, 1, 1], [], []>} : vector<8x128xbf16>, vector<128x384xbf16>, vector<8x384xf32> -> vector<8x384xf32>
    %101 = vector.extract_strided_slice %97 {offsets = [0, 0], sizes = [8, 128], strides = [1, 1]} : vector<8x384xf32> to vector<8x128xf32>
    %102 = vector.extract_strided_slice %100 {offsets = [0, 0], sizes = [8, 128], strides = [1, 1]} : vector<8x384xf32> to vector<8x128xf32>
    %103 = arith.addf %101, %102 : vector<8x128xf32>
    %104 = arith.negf %103 : vector<8x128xf32>
    %105 = math.exp %104 : vector<8x128xf32>
    %cst_43 = arith.constant 1.000000e+00 : f32
    %106 = vector.broadcast %cst_43 : f32 to vector<8x128xf32>
    %107 = arith.addf %106, %105 : vector<8x128xf32>
    %108 = arith.divf %106, %107 : vector<8x128xf32>
    %109 = vector.extract_strided_slice %97 {offsets = [0, 128], sizes = [8, 128], strides = [1, 1]} : vector<8x384xf32> to vector<8x128xf32>
    %110 = vector.extract_strided_slice %100 {offsets = [0, 128], sizes = [8, 128], strides = [1, 1]} : vector<8x384xf32> to vector<8x128xf32>
    %111 = arith.addf %109, %110 : vector<8x128xf32>
    %112 = arith.negf %111 : vector<8x128xf32>
    %113 = math.exp %112 : vector<8x128xf32>
    %cst_44 = arith.constant 1.000000e+00 : f32
    %114 = vector.broadcast %cst_44 : f32 to vector<8x128xf32>
    %115 = arith.addf %114, %113 : vector<8x128xf32>
    %116 = arith.divf %114, %115 : vector<8x128xf32>
    %117 = vector.extract_strided_slice %97 {offsets = [0, 256], sizes = [8, 128], strides = [1, 1]} : vector<8x384xf32> to vector<8x128xf32>
    %118 = vector.extract_strided_slice %100 {offsets = [0, 256], sizes = [8, 128], strides = [1, 1]} : vector<8x384xf32> to vector<8x128xf32>
    %119 = arith.addf %118, %17 : vector<8x128xf32>
    %120 = arith.mulf %108, %119 : vector<8x128xf32>
    %121 = arith.addf %117, %120 : vector<8x128xf32>
    %122 = math.tanh %121 : vector<8x128xf32>
    %cst_45 = arith.constant 1.000000e+00 : f32
    %123 = vector.broadcast %cst_45 : f32 to vector<8x128xf32>
    %124 = arith.subf %123, %116 : vector<8x128xf32>
    %125 = arith.mulf %124, %122 : vector<8x128xf32>
    %126 = arith.mulf %116, %89 : vector<8x128xf32>
    %127 = arith.addf %125, %126 : vector<8x128xf32>
    %128 = arith.truncf %127 : vector<8x128xf32> to vector<8x128xbf16>
    %129 = arith.index_cast %c2_i32 : i32 to index
    %c0_46 = arith.constant 0 : index
    %c0_47 = arith.constant 0 : index
    %130 = vector.load %arg8[%129, %c0_46, %c0_47] : memref<8x8x128xbf16, #tpu.memory_space<vmem>>, vector<1x8x128xbf16>
    %131 = vector.shape_cast %130 : vector<1x8x128xbf16> to vector<8x128xbf16>
    %132 = vector.shape_cast %128 : vector<8x128xbf16> to vector<1x8x128xbf16>
    tpu.vector_store %arg8[%129, %c0_46, %c0_47], %132 {strides = array<i32>} : memref<8x8x128xbf16, #tpu.memory_space<vmem>>, vector<1x8x128xbf16>,
    %c3_i32 = arith.constant 3 : i32
    %133 = arith.index_cast %c3_i32 : i32 to index
    %c0_48 = arith.constant 0 : index
    %c0_49 = arith.constant 0 : index
    %134 = vector.load %arg9[%133, %c0_48, %c0_49] : memref<8x8x384xf32, #tpu.memory_space<vmem>>, vector<1x8x384xf32>
    %135 = vector.shape_cast %134 : vector<1x8x384xf32> to vector<8x384xf32>
    %136 = arith.truncf %127 : vector<8x128xf32> to vector<8x128xbf16>
    %c0_50 = arith.constant 0 : index
    %c0_51 = arith.constant 0 : index
    %137 = vector.load %arg5[%c0_50, %c0_51] : memref<128x384xbf16, #tpu.memory_space<vmem>>, vector<128x384xbf16>
    %cst_52 = arith.constant dense<0.000000e+00> : vector<8x384xf32>
    %138 = tpu.matmul %136, %137, %cst_52 {dimension_numbers = #tpu.dot_dimension_numbers<[1], [0], [0], [1], [0, 0, 1, 1], [], []>} : vector<8x128xbf16>, vector<128x384xbf16>, vector<8x384xf32> -> vector<8x384xf32>
    %139 = vector.extract_strided_slice %135 {offsets = [0, 0], sizes = [8, 128], strides = [1, 1]} : vector<8x384xf32> to vector<8x128xf32>
    %140 = vector.extract_strided_slice %138 {offsets = [0, 0], sizes = [8, 128], strides = [1, 1]} : vector<8x384xf32> to vector<8x128xf32>
    %141 = arith.addf %139, %140 : vector<8x128xf32>
    %142 = arith.negf %141 : vector<8x128xf32>
    %143 = math.exp %142 : vector<8x128xf32>
    %cst_53 = arith.constant 1.000000e+00 : f32
    %144 = vector.broadcast %cst_53 : f32 to vector<8x128xf32>
    %145 = arith.addf %144, %143 : vector<8x128xf32>
    %146 = arith.divf %144, %145 : vector<8x128xf32>
    %147 = vector.extract_strided_slice %135 {offsets = [0, 128], sizes = [8, 128], strides = [1, 1]} : vector<8x384xf32> to vector<8x128xf32>
    %148 = vector.extract_strided_slice %138 {offsets = [0, 128], sizes = [8, 128], strides = [1, 1]} : vector<8x384xf32> to vector<8x128xf32>
    %149 = arith.addf %147, %148 : vector<8x128xf32>
    %150 = arith.negf %149 : vector<8x128xf32>
    %151 = math.exp %150 : vector<8x128xf32>
    %cst_54 = arith.constant 1.000000e+00 : f32
    %152 = vector.broadcast %cst_54 : f32 to vector<8x128xf32>
    %153 = arith.addf %152, %151 : vector<8x128xf32>
    %154 = arith.divf %152, %153 : vector<8x128xf32>
    %155 = vector.extract_strided_slice %135 {offsets = [0, 256], sizes = [8, 128], strides = [1, 1]} : vector<8x384xf32> to vector<8x128xf32>
    %156 = vector.extract_strided_slice %138 {offsets = [0, 256], sizes = [8, 128], strides = [1, 1]} : vector<8x384xf32> to vector<8x128xf32>
    %157 = arith.addf %156, %17 : vector<8x128xf32>
    %158 = arith.mulf %146, %157 : vector<8x128xf32>
    %159 = arith.addf %155, %158 : vector<8x128xf32>
    %160 = math.tanh %159 : vector<8x128xf32>
    %cst_55 = arith.constant 1.000000e+00 : f32
    %161 = vector.broadcast %cst_55 : f32 to vector<8x128xf32>
    %162 = arith.subf %161, %154 : vector<8x128xf32>
    %163 = arith.mulf %162, %160 : vector<8x128xf32>
    %164 = arith.mulf %154, %127 : vector<8x128xf32>
    %165 = arith.addf %163, %164 : vector<8x128xf32>
    %166 = arith.truncf %165 : vector<8x128xf32> to vector<8x128xbf16>
    %167 = arith.index_cast %c3_i32 : i32 to index
    %c0_56 = arith.constant 0 : index
    %c0_57 = arith.constant 0 : index
    %168 = vector.load %arg8[%167, %c0_56, %c0_57] : memref<8x8x128xbf16, #tpu.memory_space<vmem>>, vector<1x8x128xbf16>
    %169 = vector.shape_cast %168 : vector<1x8x128xbf16> to vector<8x128xbf16>
    %170 = vector.shape_cast %166 : vector<8x128xbf16> to vector<1x8x128xbf16>
    tpu.vector_store %arg8[%167, %c0_56, %c0_57], %170 {strides = array<i32>} : memref<8x8x128xbf16, #tpu.memory_space<vmem>>, vector<1x8x128xbf16>,
    %c4_i32 = arith.constant 4 : i32
    %171 = arith.index_cast %c4_i32 : i32 to index
    %c0_58 = arith.constant 0 : index
    %c0_59 = arith.constant 0 : index
    %172 = vector.load %arg9[%171, %c0_58, %c0_59] : memref<8x8x384xf32, #tpu.memory_space<vmem>>, vector<1x8x384xf32>
    %173 = vector.shape_cast %172 : vector<1x8x384xf32> to vector<8x384xf32>
    %174 = arith.truncf %165 : vector<8x128xf32> to vector<8x128xbf16>
    %c0_60 = arith.constant 0 : index
    %c0_61 = arith.constant 0 : index
    %175 = vector.load %arg5[%c0_60, %c0_61] : memref<128x384xbf16, #tpu.memory_space<vmem>>, vector<128x384xbf16>
    %cst_62 = arith.constant dense<0.000000e+00> : vector<8x384xf32>
    %176 = tpu.matmul %174, %175, %cst_62 {dimension_numbers = #tpu.dot_dimension_numbers<[1], [0], [0], [1], [0, 0, 1, 1], [], []>} : vector<8x128xbf16>, vector<128x384xbf16>, vector<8x384xf32> -> vector<8x384xf32>
    %177 = vector.extract_strided_slice %173 {offsets = [0, 0], sizes = [8, 128], strides = [1, 1]} : vector<8x384xf32> to vector<8x128xf32>
    %178 = vector.extract_strided_slice %176 {offsets = [0, 0], sizes = [8, 128], strides = [1, 1]} : vector<8x384xf32> to vector<8x128xf32>
    %179 = arith.addf %177, %178 : vector<8x128xf32>
    %180 = arith.negf %179 : vector<8x128xf32>
    %181 = math.exp %180 : vector<8x128xf32>
    %cst_63 = arith.constant 1.000000e+00 : f32
    %182 = vector.broadcast %cst_63 : f32 to vector<8x128xf32>
    %183 = arith.addf %182, %181 : vector<8x128xf32>
    %184 = arith.divf %182, %183 : vector<8x128xf32>
    %185 = vector.extract_strided_slice %173 {offsets = [0, 128], sizes = [8, 128], strides = [1, 1]} : vector<8x384xf32> to vector<8x128xf32>
    %186 = vector.extract_strided_slice %176 {offsets = [0, 128], sizes = [8, 128], strides = [1, 1]} : vector<8x384xf32> to vector<8x128xf32>
    %187 = arith.addf %185, %186 : vector<8x128xf32>
    %188 = arith.negf %187 : vector<8x128xf32>
    %189 = math.exp %188 : vector<8x128xf32>
    %cst_64 = arith.constant 1.000000e+00 : f32
    %190 = vector.broadcast %cst_64 : f32 to vector<8x128xf32>
    %191 = arith.addf %190, %189 : vector<8x128xf32>
    %192 = arith.divf %190, %191 : vector<8x128xf32>
    %193 = vector.extract_strided_slice %173 {offsets = [0, 256], sizes = [8, 128], strides = [1, 1]} : vector<8x384xf32> to vector<8x128xf32>
    %194 = vector.extract_strided_slice %176 {offsets = [0, 256], sizes = [8, 128], strides = [1, 1]} : vector<8x384xf32> to vector<8x128xf32>
    %195 = arith.addf %194, %17 : vector<8x128xf32>
    %196 = arith.mulf %184, %195 : vector<8x128xf32>
    %197 = arith.addf %193, %196 : vector<8x128xf32>
    %198 = math.tanh %197 : vector<8x128xf32>
    %cst_65 = arith.constant 1.000000e+00 : f32
    %199 = vector.broadcast %cst_65 : f32 to vector<8x128xf32>
    %200 = arith.subf %199, %192 : vector<8x128xf32>
    %201 = arith.mulf %200, %198 : vector<8x128xf32>
    %202 = arith.mulf %192, %165 : vector<8x128xf32>
    %203 = arith.addf %201, %202 : vector<8x128xf32>
    %204 = arith.truncf %203 : vector<8x128xf32> to vector<8x128xbf16>
    %205 = arith.index_cast %c4_i32 : i32 to index
    %c0_66 = arith.constant 0 : index
    %c0_67 = arith.constant 0 : index
    %206 = vector.load %arg8[%205, %c0_66, %c0_67] : memref<8x8x128xbf16, #tpu.memory_space<vmem>>, vector<1x8x128xbf16>
    %207 = vector.shape_cast %206 : vector<1x8x128xbf16> to vector<8x128xbf16>
    %208 = vector.shape_cast %204 : vector<8x128xbf16> to vector<1x8x128xbf16>
    tpu.vector_store %arg8[%205, %c0_66, %c0_67], %208 {strides = array<i32>} : memref<8x8x128xbf16, #tpu.memory_space<vmem>>, vector<1x8x128xbf16>,
    %c5_i32 = arith.constant 5 : i32
    %209 = arith.index_cast %c5_i32 : i32 to index
    %c0_68 = arith.constant 0 : index
    %c0_69 = arith.constant 0 : index
    %210 = vector.load %arg9[%209, %c0_68, %c0_69] : memref<8x8x384xf32, #tpu.memory_space<vmem>>, vector<1x8x384xf32>
    %211 = vector.shape_cast %210 : vector<1x8x384xf32> to vector<8x384xf32>
    %212 = arith.truncf %203 : vector<8x128xf32> to vector<8x128xbf16>
    %c0_70 = arith.constant 0 : index
    %c0_71 = arith.constant 0 : index
    %213 = vector.load %arg5[%c0_70, %c0_71] : memref<128x384xbf16, #tpu.memory_space<vmem>>, vector<128x384xbf16>
    %cst_72 = arith.constant dense<0.000000e+00> : vector<8x384xf32>
    %214 = tpu.matmul %212, %213, %cst_72 {dimension_numbers = #tpu.dot_dimension_numbers<[1], [0], [0], [1], [0, 0, 1, 1], [], []>} : vector<8x128xbf16>, vector<128x384xbf16>, vector<8x384xf32> -> vector<8x384xf32>
    %215 = vector.extract_strided_slice %211 {offsets = [0, 0], sizes = [8, 128], strides = [1, 1]} : vector<8x384xf32> to vector<8x128xf32>
    %216 = vector.extract_strided_slice %214 {offsets = [0, 0], sizes = [8, 128], strides = [1, 1]} : vector<8x384xf32> to vector<8x128xf32>
    %217 = arith.addf %215, %216 : vector<8x128xf32>
    %218 = arith.negf %217 : vector<8x128xf32>
    %219 = math.exp %218 : vector<8x128xf32>
    %cst_73 = arith.constant 1.000000e+00 : f32
    %220 = vector.broadcast %cst_73 : f32 to vector<8x128xf32>
    %221 = arith.addf %220, %219 : vector<8x128xf32>
    %222 = arith.divf %220, %221 : vector<8x128xf32>
    %223 = vector.extract_strided_slice %211 {offsets = [0, 128], sizes = [8, 128], strides = [1, 1]} : vector<8x384xf32> to vector<8x128xf32>
    %224 = vector.extract_strided_slice %214 {offsets = [0, 128], sizes = [8, 128], strides = [1, 1]} : vector<8x384xf32> to vector<8x128xf32>
    %225 = arith.addf %223, %224 : vector<8x128xf32>
    %226 = arith.negf %225 : vector<8x128xf32>
    %227 = math.exp %226 : vector<8x128xf32>
    %cst_74 = arith.constant 1.000000e+00 : f32
    %228 = vector.broadcast %cst_74 : f32 to vector<8x128xf32>
    %229 = arith.addf %228, %227 : vector<8x128xf32>
    %230 = arith.divf %228, %229 : vector<8x128xf32>
    %231 = vector.extract_strided_slice %211 {offsets = [0, 256], sizes = [8, 128], strides = [1, 1]} : vector<8x384xf32> to vector<8x128xf32>
    %232 = vector.extract_strided_slice %214 {offsets = [0, 256], sizes = [8, 128], strides = [1, 1]} : vector<8x384xf32> to vector<8x128xf32>
    %233 = arith.addf %232, %17 : vector<8x128xf32>
    %234 = arith.mulf %222, %233 : vector<8x128xf32>
    %235 = arith.addf %231, %234 : vector<8x128xf32>
    %236 = math.tanh %235 : vector<8x128xf32>
    %cst_75 = arith.constant 1.000000e+00 : f32
    %237 = vector.broadcast %cst_75 : f32 to vector<8x128xf32>
    %238 = arith.subf %237, %230 : vector<8x128xf32>
    %239 = arith.mulf %238, %236 : vector<8x128xf32>
    %240 = arith.mulf %230, %203 : vector<8x128xf32>
    %241 = arith.addf %239, %240 : vector<8x128xf32>
    %242 = arith.truncf %241 : vector<8x128xf32> to vector<8x128xbf16>
    %243 = arith.index_cast %c5_i32 : i32 to index
    %c0_76 = arith.constant 0 : index
    %c0_77 = arith.constant 0 : index
    %244 = vector.load %arg8[%243, %c0_76, %c0_77] : memref<8x8x128xbf16, #tpu.memory_space<vmem>>, vector<1x8x128xbf16>
    %245 = vector.shape_cast %244 : vector<1x8x128xbf16> to vector<8x128xbf16>
    %246 = vector.shape_cast %242 : vector<8x128xbf16> to vector<1x8x128xbf16>
    tpu.vector_store %arg8[%243, %c0_76, %c0_77], %246 {strides = array<i32>} : memref<8x8x128xbf16, #tpu.memory_space<vmem>>, vector<1x8x128xbf16>,
    %c6_i32 = arith.constant 6 : i32
    %247 = arith.index_cast %c6_i32 : i32 to index
    %c0_78 = arith.constant 0 : index
    %c0_79 = arith.constant 0 : index
    %248 = vector.load %arg9[%247, %c0_78, %c0_79] : memref<8x8x384xf32, #tpu.memory_space<vmem>>, vector<1x8x384xf32>
    %249 = vector.shape_cast %248 : vector<1x8x384xf32> to vector<8x384xf32>
    %250 = arith.truncf %241 : vector<8x128xf32> to vector<8x128xbf16>
    %c0_80 = arith.constant 0 : index
    %c0_81 = arith.constant 0 : index
    %251 = vector.load %arg5[%c0_80, %c0_81] : memref<128x384xbf16, #tpu.memory_space<vmem>>, vector<128x384xbf16>
    %cst_82 = arith.constant dense<0.000000e+00> : vector<8x384xf32>
    %252 = tpu.matmul %250, %251, %cst_82 {dimension_numbers = #tpu.dot_dimension_numbers<[1], [0], [0], [1], [0, 0, 1, 1], [], []>} : vector<8x128xbf16>, vector<128x384xbf16>, vector<8x384xf32> -> vector<8x384xf32>
    %253 = vector.extract_strided_slice %249 {offsets = [0, 0], sizes = [8, 128], strides = [1, 1]} : vector<8x384xf32> to vector<8x128xf32>
    %254 = vector.extract_strided_slice %252 {offsets = [0, 0], sizes = [8, 128], strides = [1, 1]} : vector<8x384xf32> to vector<8x128xf32>
    %255 = arith.addf %253, %254 : vector<8x128xf32>
    %256 = arith.negf %255 : vector<8x128xf32>
    %257 = math.exp %256 : vector<8x128xf32>
    %cst_83 = arith.constant 1.000000e+00 : f32
    %258 = vector.broadcast %cst_83 : f32 to vector<8x128xf32>
    %259 = arith.addf %258, %257 : vector<8x128xf32>
    %260 = arith.divf %258, %259 : vector<8x128xf32>
    %261 = vector.extract_strided_slice %249 {offsets = [0, 128], sizes = [8, 128], strides = [1, 1]} : vector<8x384xf32> to vector<8x128xf32>
    %262 = vector.extract_strided_slice %252 {offsets = [0, 128], sizes = [8, 128], strides = [1, 1]} : vector<8x384xf32> to vector<8x128xf32>
    %263 = arith.addf %261, %262 : vector<8x128xf32>
    %264 = arith.negf %263 : vector<8x128xf32>
    %265 = math.exp %264 : vector<8x128xf32>
    %cst_84 = arith.constant 1.000000e+00 : f32
    %266 = vector.broadcast %cst_84 : f32 to vector<8x128xf32>
    %267 = arith.addf %266, %265 : vector<8x128xf32>
    %268 = arith.divf %266, %267 : vector<8x128xf32>
    %269 = vector.extract_strided_slice %249 {offsets = [0, 256], sizes = [8, 128], strides = [1, 1]} : vector<8x384xf32> to vector<8x128xf32>
    %270 = vector.extract_strided_slice %252 {offsets = [0, 256], sizes = [8, 128], strides = [1, 1]} : vector<8x384xf32> to vector<8x128xf32>
    %271 = arith.addf %270, %17 : vector<8x128xf32>
    %272 = arith.mulf %260, %271 : vector<8x128xf32>
    %273 = arith.addf %269, %272 : vector<8x128xf32>
    %274 = math.tanh %273 : vector<8x128xf32>
    %cst_85 = arith.constant 1.000000e+00 : f32
    %275 = vector.broadcast %cst_85 : f32 to vector<8x128xf32>
    %276 = arith.subf %275, %268 : vector<8x128xf32>
    %277 = arith.mulf %276, %274 : vector<8x128xf32>
    %278 = arith.mulf %268, %241 : vector<8x128xf32>
    %279 = arith.addf %277, %278 : vector<8x128xf32>
    %280 = arith.truncf %279 : vector<8x128xf32> to vector<8x128xbf16>
    %281 = arith.index_cast %c6_i32 : i32 to index
    %c0_86 = arith.constant 0 : index
    %c0_87 = arith.constant 0 : index
    %282 = vector.load %arg8[%281, %c0_86, %c0_87] : memref<8x8x128xbf16, #tpu.memory_space<vmem>>, vector<1x8x128xbf16>
    %283 = vector.shape_cast %282 : vector<1x8x128xbf16> to vector<8x128xbf16>
    %284 = vector.shape_cast %280 : vector<8x128xbf16> to vector<1x8x128xbf16>
    tpu.vector_store %arg8[%281, %c0_86, %c0_87], %284 {strides = array<i32>} : memref<8x8x128xbf16, #tpu.memory_space<vmem>>, vector<1x8x128xbf16>,
    %c7_i32 = arith.constant 7 : i32
    %285 = arith.index_cast %c7_i32 : i32 to index
    %c0_88 = arith.constant 0 : index
    %c0_89 = arith.constant 0 : index
    %286 = vector.load %arg9[%285, %c0_88, %c0_89] : memref<8x8x384xf32, #tpu.memory_space<vmem>>, vector<1x8x384xf32>
    %287 = vector.shape_cast %286 : vector<1x8x384xf32> to vector<8x384xf32>
    %288 = arith.truncf %279 : vector<8x128xf32> to vector<8x128xbf16>
    %c0_90 = arith.constant 0 : index
    %c0_91 = arith.constant 0 : index
    %289 = vector.load %arg5[%c0_90, %c0_91] : memref<128x384xbf16, #tpu.memory_space<vmem>>, vector<128x384xbf16>
    %cst_92 = arith.constant dense<0.000000e+00> : vector<8x384xf32>
    %290 = tpu.matmul %288, %289, %cst_92 {dimension_numbers = #tpu.dot_dimension_numbers<[1], [0], [0], [1], [0, 0, 1, 1], [], []>} : vector<8x128xbf16>, vector<128x384xbf16>, vector<8x384xf32> -> vector<8x384xf32>
    %291 = vector.extract_strided_slice %287 {offsets = [0, 0], sizes = [8, 128], strides = [1, 1]} : vector<8x384xf32> to vector<8x128xf32>
    %292 = vector.extract_strided_slice %290 {offsets = [0, 0], sizes = [8, 128], strides = [1, 1]} : vector<8x384xf32> to vector<8x128xf32>
    %293 = arith.addf %291, %292 : vector<8x128xf32>
    %294 = arith.negf %293 : vector<8x128xf32>
    %295 = math.exp %294 : vector<8x128xf32>
    %cst_93 = arith.constant 1.000000e+00 : f32
    %296 = vector.broadcast %cst_93 : f32 to vector<8x128xf32>
    %297 = arith.addf %296, %295 : vector<8x128xf32>
    %298 = arith.divf %296, %297 : vector<8x128xf32>
    %299 = vector.extract_strided_slice %287 {offsets = [0, 128], sizes = [8, 128], strides = [1, 1]} : vector<8x384xf32> to vector<8x128xf32>
    %300 = vector.extract_strided_slice %290 {offsets = [0, 128], sizes = [8, 128], strides = [1, 1]} : vector<8x384xf32> to vector<8x128xf32>
    %301 = arith.addf %299, %300 : vector<8x128xf32>
    %302 = arith.negf %301 : vector<8x128xf32>
    %303 = math.exp %302 : vector<8x128xf32>
    %cst_94 = arith.constant 1.000000e+00 : f32
    %304 = vector.broadcast %cst_94 : f32 to vector<8x128xf32>
    %305 = arith.addf %304, %303 : vector<8x128xf32>
    %306 = arith.divf %304, %305 : vector<8x128xf32>
    %307 = vector.extract_strided_slice %287 {offsets = [0, 256], sizes = [8, 128], strides = [1, 1]} : vector<8x384xf32> to vector<8x128xf32>
    %308 = vector.extract_strided_slice %290 {offsets = [0, 256], sizes = [8, 128], strides = [1, 1]} : vector<8x384xf32> to vector<8x128xf32>
    %309 = arith.addf %308, %17 : vector<8x128xf32>
    %310 = arith.mulf %298, %309 : vector<8x128xf32>
    %311 = arith.addf %307, %310 : vector<8x128xf32>
    %312 = math.tanh %311 : vector<8x128xf32>
    %cst_95 = arith.constant 1.000000e+00 : f32
    %313 = vector.broadcast %cst_95 : f32 to vector<8x128xf32>
    %314 = arith.subf %313, %306 : vector<8x128xf32>
    %315 = arith.mulf %314, %312 : vector<8x128xf32>
    %316 = arith.mulf %306, %279 : vector<8x128xf32>
    %317 = arith.addf %315, %316 : vector<8x128xf32>
    %318 = arith.truncf %317 : vector<8x128xf32> to vector<8x128xbf16>
    %319 = arith.index_cast %c7_i32 : i32 to index
    %c0_96 = arith.constant 0 : index
    %c0_97 = arith.constant 0 : index
    %320 = vector.load %arg8[%319, %c0_96, %c0_97] : memref<8x8x128xbf16, #tpu.memory_space<vmem>>, vector<1x8x128xbf16>
    %321 = vector.shape_cast %320 : vector<1x8x128xbf16> to vector<8x128xbf16>
    %322 = vector.shape_cast %318 : vector<8x128xbf16> to vector<1x8x128xbf16>
    tpu.vector_store %arg8[%319, %c0_96, %c0_97], %322 {strides = array<i32>} : memref<8x8x128xbf16, #tpu.memory_space<vmem>>, vector<1x8x128xbf16>,
    %c8_i32 = arith.constant 8 : i32
    %c0_98 = arith.constant 0 : index
    %c0_99 = arith.constant 0 : index
    %323 = vector.load %arg10[%c0_98, %c0_99] : memref<8x128xf32, #tpu.memory_space<vmem>>, vector<8x128xf32>
    tpu.vector_store %arg10[%c0_98, %c0_99], %317 {strides = array<i32>} : memref<8x128xf32, #tpu.memory_space<vmem>>, vector<8x128xf32>,
    return
  }
  func.func @transform_0(%arg0: i32, %arg1: i32) -> (i32, i32, i32) {
    %c0_i32 = arith.constant 0 : i32
    %c0_i32_0 = arith.constant 0 : i32
    return %arg1, %arg0, %c0_i32 : i32, i32, i32
  }
  func.func @transform_1(%arg0: i32, %arg1: i32) -> (i32, i32, i32) {
    %c0_i32 = arith.constant 0 : i32
    %c0_i32_0 = arith.constant 0 : i32
    return %arg1, %arg0, %c0_i32 : i32, i32, i32
  }
  func.func @transform_2(%arg0: i32, %arg1: i32) -> (i32, i32) {
    %c0_i32 = arith.constant 0 : i32
    %c0_i32_0 = arith.constant 0 : i32
    %c0_i32_1 = arith.constant 0 : i32
    return %c0_i32, %c0_i32_0 : i32, i32
  }
  func.func @transform_3(%arg0: i32, %arg1: i32) -> (i32, i32) {
    %c0_i32 = arith.constant 0 : i32
    %c0_i32_0 = arith.constant 0 : i32
    %c0_i32_1 = arith.constant 0 : i32
    return %c0_i32, %c0_i32_0 : i32, i32
  }
  func.func @transform_4(%arg0: i32, %arg1: i32) -> (i32, i32) {
    %c0_i32 = arith.constant 0 : i32
    %c0_i32_0 = arith.constant 0 : i32
    %c0_i32_1 = arith.constant 0 : i32
    return %c0_i32, %c0_i32_0 : i32, i32
  }
  func.func @transform_5(%arg0: i32, %arg1: i32) -> (i32, i32) {
    %c0_i32 = arith.constant 0 : i32
    %c0_i32_0 = arith.constant 0 : i32
    %c0_i32_1 = arith.constant 0 : i32
    return %c0_i32, %c0_i32_0 : i32, i32
  }
  func.func @transform_6(%arg0: i32, %arg1: i32) -> (i32, i32, i32) {
    %c0_i32 = arith.constant 0 : i32
    %c0_i32_0 = arith.constant 0 : i32
    return %arg1, %arg0, %c0_i32 : i32, i32, i32
  }
}

</mosaic_0001>

<bundles_post_ra>
// kernel: tpu_custom_call.1
= control target key start
LH: loop header
LB: loop body
LE: loop exit
PB: predicated region body
PF: predicated region fallthrough
CT: control target
= control target key end

     0   :  { %11 = vsyncpa [#allocation5], 0  ;;  %s4011_s0 = inlined_call_operand.hbm [shape: bf16[8,8,128], index: 0, kind: input, shape index: {}]   ;;  %s4012_s1 = inlined_call_operand.hbm [shape: bf16[8,8,128], index: 1, kind: input, shape index: {}]   ;;  %s4013_s2 = inlined_call_operand.hbm [shape: bf16[128,384], index: 2, kind: input, shape index: {}]   ;;  %s4014_s3 = inlined_call_operand.hbm [shape: bf16[128,384], index: 3, kind: input, shape index: {}]   ;;  %s4015_s4 = inlined_call_operand.vmem [shape: f32[1,384], index: 4, kind: input, shape index: {}]   ;;  %s4016_s5 = inlined_call_operand.vmem [shape: f32[1,128], index: 5, kind: input, shape index: {}]   ;;  %s4017_s6 = inlined_call_operand.hbm [shape: bf16[8,8,128], index: 6, kind: output, shape index: {}]  }
   0x1   :  { %12 = vsyncpa [#allocation8], 0 }
   0x2   :  { %13 = vsyncpa [#allocation11], 0 }
   0x3   :  { %14 = vsyncpa [#allocation6], 0  ;;  %s3534_s21 = smov [#allocation7]   ;;  %s3535_s23 = smov [#allocation4]  }
   0x4   :  { %s32_s22 = sshll.u32 %s3534_s21, 4  ;;  %s20_s24 = sshll.u32 %s3535_s23, 4  ;;  %s33_s22 = int_to_ptr.vmem [resolvable:$true] %s32_s22  ;;  %s21_s24 = int_to_ptr.vmem [resolvable:$true] %s20_s24 }
   0x5   :  { %s3434_s25 = scalar_lea.vmem %s33_s22, 512  ;;  %p3439_p1 = scmp.lt.s32.totalorder %s33_s22, %s33_s22 }
   0x6   :  { %p3435_p0 = scmp.ne.s32.totalorder %s33_s22, %s3434_s25  ;;  %p3440_p2 = scmp.lt.s32.totalorder %s3434_s25, %s3434_s25 }
   0x8   :  { %p3441_p3 = por %p3440_p2, %p3439_p1 }
   0xa   :  { %p3442_p4 = pnand %p3441_p3, %p3435_p0 }
   0xc   :  { %3445 = shalt.err (!%p3442_p4)
}
   0xd   :  { %s3536_s26 = smov 64   ;;  %s3537_s27 = smov 4  }
   0xe   :  { %38 = dma.hbm_to_vmem [thread:$0]  %s4012_s1, 512, %s33_s22, [#allocation8], %s3536_s26, %s3536_s26, %s3537_s27  }
   0xf   :  { %s3454_s30 = scalar_lea.vmem %s21_s24, 512  ;;  %p3459_p6 = scmp.lt.s32.totalorder %s21_s24, %s21_s24 }
  0x10   :  { %p3455_p5 = scmp.ne.s32.totalorder %s21_s24, %s3454_s30  ;;  %p3460_p7 = scmp.lt.s32.totalorder %s3454_s30, %s3454_s30 }
  0x12   :  { %p3461_p8 = por %p3460_p7, %p3459_p6 }
  0x14   :  { %p3462_p9 = pnand %p3461_p8, %p3455_p5 }
  0x16   :  { %3465 = shalt.err (!%p3462_p9)
}
  0x17   :  { %26 = dma.hbm_to_vmem [thread:$0]  %s4011_s0, 512, %s21_s24, [#allocation5], %s3536_s26, %s3536_s26, %s3537_s27  }
  0x18   :  { %s3538_s9 = smov [#allocation9]  }
  0x19   :  { %s44_s10 = sshll.u32 %s3538_s9, 4  ;;  %s45_s10 = int_to_ptr.vmem [resolvable:$true] %s44_s10 }
  0x1a   :  { %s3474_s11 = scalar_lea.vmem %s45_s10, 3072  ;;  %p3479_p11 = scmp.lt.s32.totalorder %s45_s10, %s45_s10 }
  0x1b   :  { %p3475_p10 = scmp.ne.s32.totalorder %s45_s10, %s3474_s11  ;;  %p3480_p12 = scmp.lt.s32.totalorder %s3474_s11, %s3474_s11 }
  0x1d   :  { %p3481_p13 = por %p3480_p12, %p3479_p11 }
  0x1f   :  { %p3482_p0 = pnand %p3481_p13, %p3475_p10 }
  0x21   :  { %3485 = shalt.err (!%p3482_p0)
}
  0x22   :  { %s3539_s1 = smov 192   ;;  %s3540_s12 = smov 12  }
  0x23   :  { %50 = dma.hbm_to_vmem [thread:$0]  %s4013_s2, 3072, %s45_s10, [#allocation8], %s3539_s1, %s3539_s1, %s3540_s12  }
  0x24   :  { %s3541_s15 = smov [#allocation10]  }
  0x25   :  { %s56_s16 = sshll.u32 %s3541_s15, 4  ;;  %s57_s16 = int_to_ptr.vmem [resolvable:$true] %s56_s16 }
  0x26   :  { %s3494_s0 = scalar_lea.vmem %s57_s16, 3072  ;;  %p3499_p2 = scmp.lt.s32.totalorder %s57_s16, %s57_s16 }
  0x27   :  { %p3495_p1 = scmp.ne.s32.totalorder %s57_s16, %s3494_s0  ;;  %p3500_p3 = scmp.lt.s32.totalorder %s3494_s0, %s3494_s0 }
  0x29   :  { %p3501_p4 = por %p3500_p3, %p3499_p2 }
  0x2b   :  { %p3502_p5 = pnand %p3501_p4, %p3495_p1 }
  0x2d   :  { %3505 = shalt.err (!%p3502_p5)
}
  0x2e   :  { %62 = dma.hbm_to_vmem [thread:$0]  %s4014_s3, 3072, %s57_s16, [#allocation11], %s3539_s1, %s3539_s1, %s3540_s12  }
  0x2f   :  { %3526 = dma.done.wait [#allocation5], 512  }
  0x30   :  { %3527 = vsyncadd [#allocation5], 4294966784 }
  0x31   :  { %3528 = dma.done.wait [#allocation8], 3584  }
  0x32   :  { %3529 = vsyncadd [#allocation8], 4294963712 }
  0x33   :  { %3530 = dma.done.wait [#allocation11], 3072  }
  0x34   :  { %3531 = vsyncadd [#allocation11], 4294964224  ;;  %v3542_v0 = vmov 0   ;;  %v3201_v1 = vld [vmem:[#allocation9 + $0xac] ss:$12 sps:$4 sm:$0xff]   ;;  %v3543_v59 = vmov 0.0  }
  0x35   :  { %325 = vmatprep.mubr.bf16.mxu0 %v3542_v0  ;;  %v3203_v2 = vld [vmem:[#allocation9 + $0xa8] ss:$12 sps:$4 sm:$0xff]   ;;  %293 = vmatprep.subr.bf16.mxu0 %v3201_v1  ;;  %v3206_v4 = vld [vmem:[#allocation9 + $0x90] ss:$12 sps:$4 sm:$0xff]   ;;  %v3209_v6 = vld [vmem:[#allocation9 + $0x78] ss:$12 sps:$4 sm:$0xff]  }
  0x36   :  { %v3204_v3 = vld [vmem:[#allocation9 + $0x94] ss:$12 sps:$4 sm:$0xff]   ;;  %294 = vmatpush1.bf16.msra.mxu0 %v3203_v2  ;;  %v3207_v5 = vld [vmem:[#allocation9 + $0x7c] ss:$12 sps:$4 sm:$0xff]   ;;  %v3210_v7 = vld [vmem:[#allocation9 + $0x64] ss:$12 sps:$4 sm:$0xff]  }
  0x37   :  { %295 = vmatprep.subr.bf16.mxu0 %v3204_v3  ;;  %v3222_v8 = vld [vmem:[#allocation9 + $0xb0] ss:$12 sps:$4 sm:$0xff]   ;;  %v3212_v9 = vld [vmem:[#allocation9 + $0x60] ss:$12 sps:$4 sm:$0xff]   ;;  %v3226_v11 = vld [vmem:[#allocation9 + $0x98] ss:$12 sps:$4 sm:$0xff]  }
  0x38   :  { %v3213_v10 = vld [vmem:[#allocation9 + $0x4c] ss:$12 sps:$4 sm:$0xff]   ;;  %3004 = vmatprep.subr.bf16.mxu1 %v3222_v8  ;;  %v85_v12 = vld [vmem:[#allocation4] sm:$0xf]  ;;  %v86_v13 = vld [vmem:[#allocation4 + $0x4] sm:$0xf] }
  0x39   :  { %3005 = vmatpush3.bf16.msra.mxu1 %v3222_v8  ;;  %v93_v14 = vld [vmem:[#allocation7] sm:$0xf]  ;;  %v94_v15 = vld [vmem:[#allocation7 + $0x4] sm:$0xf]  ;;  %v3215_v16 = vld [vmem:[#allocation9 + $0x48] ss:$12 sps:$4 sm:$0xff]  }
  0x3a   :  { %296 = vmatpush1.bf16.msra.mxu0 %v3206_v4  ;;  %3006 = vmatprep.subr.bf16.mxu1 %v3226_v11  ;;  %v101_v17 = vmul.bf16 %v93_v14, %v85_v12  ;;  %v102_v18 = vmul.bf16 %v94_v15, %v86_v13  ;;  %v3216_v19 = vld [vmem:[#allocation9 + $0x34] ss:$12 sps:$4 sm:$0xff]   ;;  %v3218_v23 = vld [vmem:[#allocation9 + $0x30] ss:$12 sps:$4 sm:$0xff]   ;;  %v3221_v26 = vld [vmem:[#allocation9 + $0x18] ss:$12 sps:$4 sm:$0xff]  }
  0x3b   :  { %297 = vmatprep.subr.bf16.mxu0 %v3207_v5  ;;  %v3230_v21 = vld [vmem:[#allocation9 + $0x80] ss:$12 sps:$4 sm:$0xff]   ;;  %v3234_v22 = vld [vmem:[#allocation9 + $0x68] ss:$12 sps:$4 sm:$0xff]   ;;  %v3238_v25 = vld [vmem:[#allocation9 + $0x50] ss:$12 sps:$4 sm:$0xff]  }
  0x3c   :  { %v2683_v20 = vcombine.low %v101_v17, %v102_v18  ;;  %v3219_v24 = vld [vmem:[#allocation9 + $0x1c] ss:$12 sps:$4 sm:$0xff]   ;;  %v3223_v27 = vld [vmem:[#allocation9 + $0x4] ss:$12 sps:$4 sm:$0xff]   ;;  %v3225_v29 = vld [vmem:[#allocation9] ss:$12 sps:$4 sm:$0xff]  }
  0x3d   :  { %3007 = vmatpush3.bf16.msra.mxu1 %v3226_v11  ;;  %v3242_v28 = vld [vmem:[#allocation9 + $0x38] ss:$12 sps:$4 sm:$0xff]   ;;  %v3603_v31 = vld [vmem:[#allocation10 + $0xa8] ss:$12 sps:$4 sm:$0xff]   ;;  %v3246_v33 = vld [vmem:[#allocation9 + $0x20] ss:$12 sps:$4 sm:$0xff]  }
  0x3e   :  { %298 = vmatpush1.bf16.msra.mxu0 %v3209_v6  ;;  %3008 = vmatprep.subr.bf16.mxu1 %v3230_v21  ;;  %v3601_v30 = vld [vmem:[#allocation10 + $0xac] ss:$12 sps:$4 sm:$0xff]   ;;  %v87_v32 = vld [vmem:[#allocation4 + $0x8] sm:$0xf]  ;;  %v3606_v37 = vld [vmem:[#allocation10 + $0x94] ss:$12 sps:$4 sm:$0xff]  }
  0x3f   :  { %299 = vmatprep.subr.bf16.mxu0 %v3210_v7  ;;  %3020 = vmatprep.mubr.bf16.mxu1 %v2683_v20  ;;  %v88_v34 = vld [vmem:[#allocation4 + $0xc] sm:$0xf]  ;;  %v95_v35 = vld [vmem:[#allocation7 + $0x8] sm:$0xf]  ;;  %v3608_v38 = vld [vmem:[#allocation10 + $0x90] ss:$12 sps:$4 sm:$0xff]  }
  0x40   :  { %v96_v36 = vld [vmem:[#allocation7 + $0xc] sm:$0xf]  ;;  %v103_v39 = vmul.bf16 %v95_v35, %v87_v32  ;;  %v3610_v41 = vld [vmem:[#allocation10 + $0x7c] ss:$12 sps:$4 sm:$0xff]   ;;  %v89_v42 = vld [vmem:[#allocation4 + $0x10] sm:$0xf] }
  0x41   :  { %3009 = vmatpush3.bf16.msra.mxu1 %v3230_v21  ;;  %v104_v40 = vmul.bf16 %v96_v36, %v88_v34  ;;  %v90_v43 = vld [vmem:[#allocation4 + $0x14] sm:$0xf]  ;;  %v97_v45 = vld [vmem:[#allocation7 + $0x10] sm:$0xf]  ;;  %v3616_v48 = vld [vmem:[#allocation10 + $0x78] ss:$12 sps:$4 sm:$0xff]  }
  0x42   :  { %300 = vmatpush1.bf16.msra.mxu0 %v3212_v9  ;;  %3010 = vmatprep.subr.bf16.mxu1 %v3234_v22  ;;  %v3250_v44 = vld [vmem:[#allocation9 + $0x8] ss:$12 sps:$4 sm:$0xff]   ;;  %v105_v49 = vmul.bf16 %v97_v45, %v89_v42  ;;  %v3619_v51 = vld [vmem:[#allocation10 + $0x64] ss:$12 sps:$4 sm:$0xff]   ;;  %v3621_v52 = vld [vmem:[#allocation10 + $0x60] ss:$12 sps:$4 sm:$0xff]  }
  0x43   :  { %301 = vmatprep.subr.bf16.mxu0 %v3213_v10  ;;  %v98_v46 = vld [vmem:[#allocation7 + $0x14] sm:$0xf]  ;;  %v2684_v47 = vcombine.low %v103_v39, %v104_v40  ;;  %v91_v53 = vld [vmem:[#allocation4 + $0x18] sm:$0xf]  ;;  %v92_v54 = vld [vmem:[#allocation4 + $0x1c] sm:$0xf] }
  0x44   :  { %v106_v50 = vmul.bf16 %v98_v46, %v90_v43  ;;  %v99_v55 = vld [vmem:[#allocation7 + $0x18] sm:$0xf]  ;;  %v3257_v56 = vld [vmem:[#allocation10 + $0xb0] ss:$12 sps:$4 sm:$0xff]   ;;  %v3629_v62 = vld [vmem:[#allocation10 + $0x48] ss:$12 sps:$4 sm:$0xff]  }
  0x45   :  { %3011 = vmatpush3.bf16.msra.mxu1 %v3234_v22  ;;  %v3623_v57 = vld [vmem:[#allocation10 + $0x4c] ss:$12 sps:$4 sm:$0xff]   ;;  %v100_v58 = vld [vmem:[#allocation7 + $0x1c] sm:$0xf]  ;;  %v3631_v63 = vld [vmem:[#allocation10 + $0x34] ss:$12 sps:$4 sm:$0xff]   ;;  %v107_v1 = vmul.bf16 %v99_v55, %v91_v53 }
  0x46   :  { %302 = vmatpush1.bf16.msra.mxu0 %v3215_v16  ;;  %3012 = vmatprep.subr.bf16.mxu1 %v3238_v25  ;;  %v2685_v60 = vcombine.low %v105_v49, %v106_v50  ;;  %v3258_v61 = vld [vmem:[#allocation10 + $0x98] ss:$12 sps:$4 sm:$0xff]   ;;  %v108_v2 = vmul.bf16 %v100_v58, %v92_v54  ;;  %v3259_v3 = vld [vmem:[#allocation10 + $0x80] ss:$12 sps:$4 sm:$0xff]   ;;  %v3636_v4 = vld [vmem:[#allocation10 + $0x30] ss:$12 sps:$4 sm:$0xff]  }
  0x47   :  { %303 = vmatprep.subr.bf16.mxu0 %v3216_v19  ;;  %v3638_v6 = vld [vmem:[#allocation10 + $0x1c] ss:$12 sps:$4 sm:$0xff]   ;;  %v3644_v8 = vld [vmem:[#allocation10 + $0x18] ss:$12 sps:$4 sm:$0xff]   ;;  %vm3544_vm0 = vmmov 0   ;;  %v3545_v14 = vmov 0.0|0.0  }
  0x48   :  { %v2686_v5 = vcombine.low %v107_v1, %v108_v2  ;;  %v3260_v7 = vld [vmem:[#allocation10 + $0x68] ss:$12 sps:$4 sm:$0xff]   ;;  %v3648_v9 = vld [vmem:[#allocation10 + $0x4] ss:$12 sps:$4 sm:$0xff]   ;;  %v3653_v11 = vld [vmem:[#allocation10] ss:$12 sps:$4 sm:$0xff]  }
  0x49   :  { %3013 = vmatpush3.bf16.msra.mxu1 %v3238_v25  ;;  %v3261_v10 = vld [vmem:[#allocation10 + $0x50] ss:$12 sps:$4 sm:$0xff]   ;;  %v3262_v12 = vld [vmem:[#allocation10 + $0x38] ss:$12 sps:$4 sm:$0xff]   ;;  %v3263_v13 = vld [vmem:[#allocation10 + $0x20] ss:$12 sps:$4 sm:$0xff]  }
  0x4a   :  { %304 = vmatpush1.bf16.msra.mxu0 %v3218_v23  ;;  %3014 = vmatprep.subr.bf16.mxu1 %v3242_v28  ;;  %v3264_v15 = vld [vmem:[#allocation10 + $0x8] ss:$12 sps:$4 sm:$0xff]   ;;  %v3265_v16 = vld [vmem:[#allocation10 + $0xb0] ss:$12 sps:$4 sm:$0xff]   ;;  %v3266_v17 = vld [vmem:[#allocation10 + $0x98] ss:$12 sps:$4 sm:$0xff]  }
  0x4b   :  { %305 = vmatprep.subr.bf16.mxu0 %v3219_v24  ;;  %v3267_v18 = vld [vmem:[#allocation10 + $0x80] ss:$12 sps:$4 sm:$0xff]   ;;  %v3268_v19 = vld [vmem:[#allocation10 + $0x68] ss:$12 sps:$4 sm:$0xff]   ;;  %v3270_v21 = vld [vmem:[#allocation10 + $0x38] ss:$12 sps:$4 sm:$0xff]   ;;  %v433_v24 = vlaneseq }
  0x4c   :  { %v3271_v22 = vld [vmem:[#allocation10 + $0x20] ss:$12 sps:$4 sm:$0xff]   ;;  %v3272_v23 = vld [vmem:[#allocation10 + $0x8] ss:$12 sps:$4 sm:$0xff]   ;;  %s3546_s22 = smov [#allocation12]  }
  0x4d   :  { %3015 = vmatpush3.bf16.msra.mxu1 %v3242_v28  ;;  %v434_v25 = vshrl.u32 %v433_v24, 7  ;;  %v431_v28 = vld [vmem:[%s4015_s4] sm:$0x7]  ;;  %s2669_s23 = sshll.u32 %s3546_s22, 4  ;;  %s2670_s23 = int_to_ptr.vmem [resolvable:$true] %s2669_s23 }
  0x4e   :  { %306 = vmatpush1.bf16.msra.mxu0 %v3221_v26  ;;  %3016 = vmatprep.subr.bf16.mxu1 %v3246_v33  ;;  %s3506_s24 = scalar_lea.vmem %s2670_s23, 512  ;;  %p3511_p7 = scmp.lt.s32.totalorder %s2670_s23, %s2670_s23 }
  0x4f   :  { %307 = vmatprep.subr.bf16.mxu0 %v3223_v27  ;;  %v435_v26 = vsub.s32 0, %v434_v25  ;;  %v443_v34 = vsub.s32 2, %v434_v25  ;;  %p3507_p6 = scmp.ne.s32.totalorder %s2670_s23, %s3506_s24  ;;  %p3512_p8 = scmp.lt.s32.totalorder %s3506_s24, %s3506_s24 }
  0x51   :  { %3017 = vmatpush3.bf16.msra.mxu1 %v3246_v33  ;;  %v436_v33 = vrot.slane %v431_v28, %v435_v26  ;;  %v3699_v43 = vrot.slane %v431_v28, %v443_v34  ;;  %p3513_p9 = por %p3512_p8, %p3511_p7 }
  0x52   :  { %308 = vmatpush1.bf16.msra.mxu0 %v3225_v29  ;;  %3018 = vmatprep.subr.bf16.mxu1 %v3250_v44  ;;  %v439_v29 = vsub.s32 1, %v434_v25 }
  0x53   :  { %668 = vmatprep.subr.bf16.mxu0 %v3601_v30  ;;  %p3514_p10 = pnand %p3513_p9, %p3507_p6 }
  0x54   :  { %v440_v36 = vrot.slane %v431_v28, %v439_v29 }
  0x55   :  { %326 = vmatmul.mubr.bf16.vlgmr.msra.gmra.mxu0 %v2683_v20  ;;  %3019 = vmatpush3.bf16.msra.mxu1 %v3250_v44  ;;  %v3269_v20 = vld [vmem:[#allocation10 + $0x50] ss:$12 sps:$4 sm:$0xff]  }
  0x56   :  { %669 = vmatpush1.bf16.msra.mxu0 %v3603_v31  ;;  %335 = vmatprep.mubr.bf16.mxu0 %v3542_v0 }
  0x57   :  { %670 = vmatprep.subr.bf16.mxu0 %v3606_v37  ;;  %3028 = vmatprep.subr.bf16.mxu1 %v3543_v59 }
  0x58   :  { %3021 = vmatmul.mubr.bf16.vlgmr.msra.gmra.mxu1 %v2684_v47 }
  0x59   :  { %3029 = vmatpush3.bf16.msra.mxu1 %v3257_v56  ;;  %3024 = vmatprep.mubr.bf16.mxu1 %v2685_v60 }
  0x5a   :  { %671 = vmatpush1.bf16.msra.mxu0 %v3608_v38  ;;  %3030 = vmatprep.subr.bf16.mxu1 %v3543_v59 }
  0x5b   :  { %672 = vmatprep.subr.bf16.mxu0 %v3610_v41 }
  0x5d   :  { %336 = vmatmul.mubr.bf16.gmra.mxu0 %v2684_v47  ;;  %3031 = vmatpush3.bf16.msra.mxu1 %v3258_v61 }
  0x5e   :  { %673 = vmatpush1.bf16.msra.mxu0 %v3616_v48  ;;  %345 = vmatprep.mubr.bf16.mxu0 %v3542_v0 }
  0x5f   :  { %674 = vmatprep.subr.bf16.mxu0 %v3619_v51  ;;  %3032 = vmatprep.subr.bf16.mxu1 %v3543_v59 }
  0x60   :  { %3025 = vmatmul.mubr.bf16.gmra.mxu1 %v2686_v5 }
  0x61   :  { %3033 = vmatpush3.bf16.msra.mxu1 %v3259_v3  ;;  %3044 = vmatprep.mubr.msk.bf16.mxu1 %vm3544_vm0, %v3543_v59 }
  0x62   :  { %675 = vmatpush1.bf16.msra.mxu0 %v3621_v52  ;;  %3034 = vmatprep.subr.bf16.mxu1 %v3543_v59 }
  0x63   :  { %676 = vmatprep.subr.bf16.mxu0 %v3623_v57 }
  0x65   :  { %346 = vmatmul.mubr.bf16.gmra.mxu0 %v2685_v60  ;;  %3035 = vmatpush3.bf16.msra.mxu1 %v3260_v7 }
  0x66   :  { %677 = vmatpush1.bf16.msra.mxu0 %v3629_v62  ;;  %355 = vmatprep.mubr.bf16.mxu0 %v3542_v0 }
  0x67   :  { %678 = vmatprep.subr.bf16.mxu0 %v3631_v63  ;;  %3036 = vmatprep.subr.bf16.mxu1 %v3543_v59 }
  0x69   :  { %3037 = vmatpush3.bf16.msra.mxu1 %v3261_v10 }
  0x6a   :  { %679 = vmatpush1.bf16.msra.mxu0 %v3636_v4  ;;  %3038 = vmatprep.subr.bf16.mxu1 %v3543_v59 }
  0x6b   :  { %680 = vmatprep.subr.bf16.mxu0 %v3638_v6 }
  0x6d   :  { %356 = vmatmul.mubr.bf16.gmra.mxu0 %v2686_v5  ;;  %3039 = vmatpush3.bf16.msra.mxu1 %v3262_v12 }
  0x6e   :  { %681 = vmatpush1.bf16.msra.mxu0 %v3644_v8  ;;  %700 = vmatprep.mubr.bf16.mxu0 %v3542_v0 }
  0x6f   :  { %682 = vmatprep.subr.bf16.mxu0 %v3648_v9  ;;  %3040 = vmatprep.subr.bf16.mxu1 %v3543_v59 }
  0x71   :  { %3041 = vmatpush3.bf16.msra.mxu1 %v3263_v13 }
  0x72   :  { %683 = vmatpush1.bf16.msra.mxu0 %v3653_v11  ;;  %3042 = vmatprep.subr.bf16.mxu1 %v3543_v59 }
  0x73   :  { %937 = vmatprep.subr.bf16.mxu0 %v3601_v30 }
  0x75   :  { %701 = vmatmul.mubr.bf16.vlgmr.msra.gmra.mxu0 %v3545_v14  ;;  %3043 = vmatpush3.bf16.msra.mxu1 %v3264_v15 }
  0x76   :  { %938 = vmatpush1.bf16.msra.mxu0 %v3603_v31  ;;  %969 = vmatprep.mubr.bf16.mxu0 %v3542_v0 }
  0x77   :  { %939 = vmatprep.subr.bf16.mxu0 %v3606_v37  ;;  %3048 = vmatprep.subr.bf16.mxu1 %v3543_v59 }
  0x78   :  { %3045 = vmatmul.mubr.bf16.vlgmr.msra.gmra.mxu1 %v3545_v14 }
  0x79   :  { %3064 = vmatprep.mubr.msk.bf16.mxu1 %vm3544_vm0, %v3543_v59  ;;  %3049 = vmatpush3.bf16.msra.mxu1 %v3265_v16 }
  0x7a   :  { %940 = vmatpush1.bf16.msra.mxu0 %v3608_v38  ;;  %3050 = vmatprep.subr.bf16.mxu1 %v3543_v59 }
  0x7b   :  { %941 = vmatprep.subr.bf16.mxu0 %v3610_v41 }
  0x7d   :  { %3051 = vmatpush3.bf16.msra.mxu1 %v3266_v17 }
  0x7e   :  { %942 = vmatpush1.bf16.msra.mxu0 %v3616_v48  ;;  %3052 = vmatprep.subr.bf16.mxu1 %v3543_v59 }
  0x7f   :  { %943 = vmatprep.subr.bf16.mxu0 %v3619_v51 }
  0x81   :  { %3053 = vmatpush3.bf16.msra.mxu1 %v3267_v18 }
  0x82   :  { %944 = vmatpush1.bf16.msra.mxu0 %v3621_v52  ;;  %3054 = vmatprep.subr.bf16.mxu1 %v3543_v59 }
  0x83   :  { %945 = vmatprep.subr.bf16.mxu0 %v3623_v57 }
  0x85   :  { %3055 = vmatpush3.bf16.msra.mxu1 %v3268_v19 }
  0x86   :  { %946 = vmatpush1.bf16.msra.mxu0 %v3629_v62  ;;  %3056 = vmatprep.subr.bf16.mxu1 %v3543_v59 }
  0x87   :  { %947 = vmatprep.subr.bf16.mxu0 %v3631_v63 }
  0x89   :  { %3057 = vmatpush3.bf16.msra.mxu1 %v3269_v20 }
  0x8a   :  { %948 = vmatpush1.bf16.msra.mxu0 %v3636_v4  ;;  %3058 = vmatprep.subr.bf16.mxu1 %v3543_v59 }
  0x8b   :  { %949 = vmatprep.subr.bf16.mxu0 %v3638_v6 }
  0x8d   :  { %3059 = vmatpush3.bf16.msra.mxu1 %v3270_v21 }
  0x8e   :  { %950 = vmatpush1.bf16.msra.mxu0 %v3644_v8  ;;  %3060 = vmatprep.subr.bf16.mxu1 %v3543_v59 }
  0x8f   :  { %951 = vmatprep.subr.bf16.mxu0 %v3648_v9 }
  0x91   :  { %3061 = vmatpush3.bf16.msra.mxu1 %v3271_v22 }
  0x92   :  { %952 = vmatpush1.bf16.msra.mxu0 %v3653_v11  ;;  %3062 = vmatprep.subr.bf16.mxu1 %v3543_v59 }
  0x93   :  { %1207 = vmatprep.subr.bf16.mxu0 %v3601_v30 }
  0x95   :  { %3063 = vmatpush3.bf16.msra.mxu1 %v3272_v23 }
  0x96   :  { %3068 = vmatprep.subr.bf16.mxu1 %v3543_v59 }
 0x115   :  { %v327_v27 = vpop.f32.mrf.mxu0 }
 0x117   :  { %v329_v32 = vpop.f32.mrf.mxu0 }
 0x118   :  { %v3022_v47 = vpop.f32.mrf.mxu1 }
 0x119   :  { %v331_v35 = vpop.f32.mrf.mxu0  ;;  %v3706_v50 = vadd.f32 %v3022_v47, %v3699_v43 }
 0x11a   :  { %v3695_v39 = vadd.f32 %v436_v33, %v331_v35  ;;  %v400_v54 = vpop.f32.mrf.mxu1 }
 0x11b   :  { %v333_v40 = vpop.f32.mrf.mxu0 }
 0x11c   :  { %v3697_v42 = vadd.f32 %v440_v36, %v333_v40  ;;  %v3023_v58 = vpop.f32.mrf.mxu1  ;;  %v448_v40 = vadd.f32 %v436_v33, %v327_v27 }
 0x11d   :  { %v337_v44 = vpop.f32.mrf.mxu0  ;;  %v3713_v61 = vadd.f32 %v3023_v58, %v3699_v43 }
 0x11e   :  { %v3701_v45 = vadd.f32 %v436_v33, %v337_v44  ;;  %v403_v2 = vpop.f32.mrf.mxu1 }
 0x11f   :  { %v339_v46 = vpop.f32.mrf.mxu0  ;;  %v3718_v5 = vadd.f32 %v3699_v43, %v403_v2 }
 0x120   :  { %v3703_v49 = vadd.f32 %v440_v36, %v339_v46  ;;  %v3026_v10 = vpop.f32.mrf.mxu1 }
 0x121   :  { %v341_v53 = vpop.f32.mrf.mxu0  ;;  %v3723_v13 = vadd.f32 %v3026_v10, %v3699_v43 }
 0x122   :  { %v3708_v55 = vadd.f32 %v436_v33, %v341_v53  ;;  %v416_v15 = vpop.f32.mrf.mxu1 }
 0x123   :  { %v343_v56 = vpop.f32.mrf.mxu0  ;;  %v3728_v17 = vadd.f32 %v3699_v43, %v416_v15 }
 0x124   :  { %v3710_v60 = vadd.f32 %v440_v36, %v343_v56  ;;  %v3027_v19 = vpop.f32.mrf.mxu1 }
 0x125   :  { %v347_v1 = vpop.f32.mrf.mxu0  ;;  %v3733_v21 = vadd.f32 %v3027_v19, %v3699_v43 }
 0x126   :  { %v3715_v3 = vadd.f32 %v436_v33, %v347_v1  ;;  %v419_v23 = vpop.f32.mrf.mxu1  ;;  %v449_v1 = vadd.f32 %v440_v36, %v329_v32 }
 0x127   :  { %v349_v7 = vpop.f32.mrf.mxu0  ;;  %v3738_v25 = vadd.f32 %v3699_v43, %v419_v23 }
 0x128   :  { %v3720_v12 = vadd.f32 %v440_v36, %v349_v7 }
 0x129   :  { %v351_v14 = vpop.f32.mrf.mxu0 }
 0x12a   :  { %v3725_v16 = vadd.f32 %v436_v33, %v351_v14 }
 0x12b   :  { %v353_v18 = vpop.f32.mrf.mxu0 }
 0x12c   :  { %v3730_v20 = vadd.f32 %v440_v36, %v353_v18 }
 0x12d   :  { %v357_v22 = vpop.f32.mrf.mxu0 }
 0x12e   :  { %v3735_v24 = vadd.f32 %v436_v33, %v357_v22 }
 0x12f   :  { %v359_v26 = vpop.f32.mrf.mxu0 }
 0x130   :  { %v3740_v28 = vadd.f32 %v440_v36, %v359_v26 }
 0x131   :  { %v361_v29 = vpop.f32.mrf.mxu0 }
 0x132   :  { %v3742_v34 = vadd.f32 %v436_v33, %v361_v29  ;;  %v3749_v33 = vld [vmem:[%s4016_s5] ss:$0 sm:$0xff]  ;;  %v450_v29 = vadd.f32 %v3699_v43, %v400_v54  ;;  %v3273_v43 = vld [vmem:[#allocation10 + $0xb0] ss:$12 sps:$4 sm:$0xff]   ;;  %v3274_v54 = vld [vmem:[#allocation10 + $0x98] ss:$12 sps:$4 sm:$0xff]  }
 0x133   :  { %v363_v35 = vpop.f32.mrf.mxu0 }
 0x134   :  { %v3744_v44 = vadd.f32 %v440_v36, %v363_v35 }
 0x135   :  { %v702_v46 = vpop.f32.mrf.mxu0 }
 0x136   :  { %v749_v47 = vadd.f32 %v702_v46, %v448_v40 }
 0x137   :  { %v704_v53 = vpop.f32.mrf.mxu0 }
 0x138   :  { %v2736_v56 = vmul.f32 -1.442695, %v749_v47  ;;  %v756_v7 = vadd.f32 %v704_v53, %v449_v1  ;;  %v743_v10 = vpop.f32.mrf.mxu1 }
 0x139   :  { %v706_v58 = vpop.f32.mrf.mxu0  ;;  %v763_v32 = vadd.f32 %v3749_v33, %v743_v10  ;;  %v3276_v10 = vld [vmem:[#allocation10 + $0x68] ss:$12 sps:$4 sm:$0xff]  }
 0x13a   :  { %3345 = vpow2.f32 %v2736_v56  ;;  %v2737_v14 = vmul.f32 -1.442695, %v756_v7  ;;  %v3046_v15 = vpop.f32.mrf.mxu1  ;;  %v3275_v7 = vld [vmem:[#allocation10 + $0x80] ss:$12 sps:$4 sm:$0xff]  }
 0x13b   :  { %v707_v2 = vpop.f32.mrf.mxu0  ;;  %v3278_v15 = vld [vmem:[#allocation10 + $0x38] ss:$12 sps:$4 sm:$0xff]  }
 0x13c   :  { %v746_v18 = vpop.f32.mrf.mxu1  ;;  %3347 = vpow2.f32 %v2737_v14  ;;  %v3277_v14 = vld [vmem:[#allocation10 + $0x50] ss:$12 sps:$4 sm:$0xff]  }
 0x13d   :  { %v3280_v18 = vld [vmem:[#allocation10 + $0x8] ss:$12 sps:$4 sm:$0xff]  }
 0x13e   :  { %v3047_v19 = vpop.f32.mrf.mxu1 }
 0x147   :  { %v3346_v22 = vpop.eup %3345 }
 0x148   :  { %v753_v23 = vadd.f32 1.0, %v3346_v22 }
 0x149   :  { %v3348_v27 = vpop.eup %3347 }
 0x14a   :  { %3349 = vrcp.f32 %v753_v23  ;;  %v760_v26 = vadd.f32 1.0, %v3348_v27 }
 0x14c   :  { %3351 = vrcp.f32 %v760_v26 }
 0x157   :  { %v3350_v36 = vpop.eup %3349 }
 0x158   :  { %v764_v35 = vmul.f32 %v3350_v36, %v763_v32 }
 0x159   :  { %v3352_v46 = vpop.eup %3351 }
 0x15a   :  { %v765_v40 = vadd.f32 %v764_v35, %v450_v29  ;;  %v767_v47 = vsub.f32 1.0, %v3352_v46  ;;  %v769_v58 = vmul.f32 0.0, %v3352_v46 }
 0x15c   :  { %3353 = vtanh.f32 %v765_v40 }
 0x169   :  { %v3354_v53 = vpop.eup %3353 }
 0x16a   :  { %v768_v56 = vmul.f32 %v3354_v53, %v767_v47 }
 0x16c   :  { %v3753_v1 = vadd.f32 %v769_v58, %v768_v56 }
 0x16e   :  { %v771_v2 = vpack.c.bf16 %v3753_v1, %v3753_v1 }
 0x170   :  { %772 = vst [vmem:[#allocation12] sm:$0xf] %v771_v2  ;;  %970 = vmatmul.mubr.bf16.vlgmr.msra.gmra.mxu0 %v771_v2  ;;  %3065 = vmatmul.mubr.bf16.vlgmr.msra.gmra.mxu1 %v771_v2 }
 0x171   :  { %1208 = vmatpush1.bf16.msra.mxu0 %v3603_v31  ;;  %1239 = vmatprep.mubr.bf16.mxu0 %v3542_v0 }
 0x172   :  { %1209 = vmatprep.subr.bf16.mxu0 %v3606_v37  ;;  %3084 = vmatprep.mubr.msk.bf16.mxu1 %vm3544_vm0, %v3543_v59 }
 0x173   :  { %3069 = vmatpush3.bf16.msra.mxu1 %v3273_v43 }
 0x174   :  { %3070 = vmatprep.subr.bf16.mxu1 %v3543_v59 }
 0x175   :  { %1210 = vmatpush1.bf16.msra.mxu0 %v3608_v38 }
 0x176   :  { %1211 = vmatprep.subr.bf16.mxu0 %v3610_v41 }
 0x177   :  { %3071 = vmatpush3.bf16.msra.mxu1 %v3274_v54 }
 0x178   :  { %3072 = vmatprep.subr.bf16.mxu1 %v3543_v59 }
 0x179   :  { %1212 = vmatpush1.bf16.msra.mxu0 %v3616_v48 }
 0x17a   :  { %1213 = vmatprep.subr.bf16.mxu0 %v3619_v51 }
 0x17b   :  { %3073 = vmatpush3.bf16.msra.mxu1 %v3275_v7 }
 0x17c   :  { %3074 = vmatprep.subr.bf16.mxu1 %v3543_v59 }
 0x17d   :  { %1214 = vmatpush1.bf16.msra.mxu0 %v3621_v52 }
 0x17e   :  { %1215 = vmatprep.subr.bf16.mxu0 %v3623_v57 }
 0x17f   :  { %3075 = vmatpush3.bf16.msra.mxu1 %v3276_v10 }
 0x180   :  { %3076 = vmatprep.subr.bf16.mxu1 %v3543_v59 }
 0x181   :  { %1216 = vmatpush1.bf16.msra.mxu0 %v3629_v62 }
 0x182   :  { %1217 = vmatprep.subr.bf16.mxu0 %v3631_v63 }
 0x183   :  { %3077 = vmatpush3.bf16.msra.mxu1 %v3277_v14 }
 0x184   :  { %3078 = vmatprep.subr.bf16.mxu1 %v3543_v59 }
 0x185   :  { %1218 = vmatpush1.bf16.msra.mxu0 %v3636_v4 }
 0x186   :  { %1219 = vmatprep.subr.bf16.mxu0 %v3638_v6 }
 0x187   :  { %3079 = vmatpush3.bf16.msra.mxu1 %v3278_v15 }
 0x188   :  { %3080 = vmatprep.subr.bf16.mxu1 %v3543_v59 }
 0x189   :  { %1220 = vmatpush1.bf16.msra.mxu0 %v3644_v8 }
 0x18a   :  { %1221 = vmatprep.subr.bf16.mxu0 %v3648_v9 }
 0x18d   :  { %1222 = vmatpush1.bf16.msra.mxu0 %v3653_v11 }
 0x18e   :  { %1477 = vmatprep.subr.bf16.mxu0 %v3601_v30  ;;  %v3279_v30 = vld [vmem:[#allocation10 + $0x20] ss:$12 sps:$4 sm:$0xff]  }
 0x18f   :  { %3081 = vmatpush3.bf16.msra.mxu1 %v3279_v30 }
 0x190   :  { %3082 = vmatprep.subr.bf16.mxu1 %v3543_v59 }
 0x193   :  { %3083 = vmatpush3.bf16.msra.mxu1 %v3280_v18 }
 0x194   :  { %3088 = vmatprep.subr.bf16.mxu1 %v3543_v59 }
 0x230   :  { %v971_v19 = vpop.f32.mrf.mxu0  ;;  %v1012_v22 = vpop.f32.mrf.mxu1 }
 0x231   :  { %v1018_v23 = vadd.f32 %v971_v19, %v3695_v39  ;;  %v1032_v43 = vadd.f32 %v3749_v33, %v1012_v22 }
 0x232   :  { %v973_v27 = vpop.f32.mrf.mxu0  ;;  %v3066_v26 = vpop.f32.mrf.mxu1 }
 0x233   :  { %v2762_v32 = vmul.f32 -1.442695, %v1018_v23  ;;  %v1025_v46 = vadd.f32 %v973_v27, %v3697_v42 }
 0x234   :  { %v975_v36 = vpop.f32.mrf.mxu0  ;;  %v1015_v29 = vpop.f32.mrf.mxu1 }
 0x235   :  { %3355 = vpow2.f32 %v2762_v32  ;;  %v2763_v47 = vmul.f32 -1.442695, %v1025_v46 }
 0x236   :  { %v976_v35 = vpop.f32.mrf.mxu0  ;;  %v3067_v40 = vpop.f32.mrf.mxu1 }
 0x237   :  { %3357 = vpow2.f32 %v2763_v47 }
 0x242   :  { %v3356_v53 = vpop.eup %3355 }
 0x243   :  { %v1022_v56 = vadd.f32 1.0, %v3356_v53 }
 0x244   :  { %v3358_v58 = vpop.eup %3357 }
 0x245   :  { %3359 = vrcp.f32 %v1022_v56  ;;  %v1029_v2 = vadd.f32 1.0, %v3358_v58 }
 0x247   :  { %3361 = vrcp.f32 %v1029_v2 }
 0x252   :  { %v3360_v39 = vpop.eup %3359 }
 0x253   :  { %v1033_v54 = vmul.f32 %v3360_v39, %v1032_v43  ;;  %v3833_v39 = vld [vmem:[#allocation10 + $0xa8] ss:$12 sps:$4 sm:$0xff]  }
 0x254   :  { %v3362_v10 = vpop.eup %3361 }
 0x255   :  { %v1034_v7 = vadd.f32 %v1033_v54, %v3718_v5  ;;  %v1036_v14 = vsub.f32 1.0, %v3362_v10  ;;  %v1038_v42 = vmul.f32 %v3362_v10, %v3753_v1  ;;  %v3292_v54 = vld [vmem:[#allocation10 + $0xb0] ss:$12 sps:$4 sm:$0xff]  }
 0x256   :  { %v3840_v10 = vld [vmem:[#allocation10 + $0x90] ss:$12 sps:$4 sm:$0xff]  }
 0x257   :  { %3363 = vtanh.f32 %v1034_v7  ;;  %v3837_v7 = vld [vmem:[#allocation10 + $0x94] ss:$12 sps:$4 sm:$0xff]  }
 0x264   :  { %v3364_v15 = vpop.eup %3363 }
 0x265   :  { %v1037_v30 = vmul.f32 %v3364_v15, %v1036_v14  ;;  %v3296_v14 = vld [vmem:[#allocation10 + $0x98] ss:$12 sps:$4 sm:$0xff]   ;;  %v3844_v15 = vld [vmem:[#allocation10 + $0x7c] ss:$12 sps:$4 sm:$0xff]  }
 0x267   :  { %v3789_v18 = vadd.f32 %v1038_v42, %v1037_v30  ;;  %v3847_v30 = vld [vmem:[#allocation10 + $0x78] ss:$12 sps:$4 sm:$0xff]   ;;  %v3300_v42 = vld [vmem:[#allocation10 + $0x80] ss:$12 sps:$4 sm:$0xff]  }
 0x269   :  { %v1040_v19 = vpack.c.bf16 %v3789_v18, %v3789_v18 }
 0x26b   :  { %1042 = vst [vmem:[#allocation12 + $0x4] sm:$0xf] %v1040_v19  ;;  %1240 = vmatmul.mubr.bf16.vlgmr.msra.gmra.mxu0 %v1040_v19  ;;  %3085 = vmatmul.mubr.bf16.vlgmr.msra.gmra.mxu1 %v1040_v19  ;;  %v3854_v19 = vld [vmem:[#allocation10 + $0x60] ss:$12 sps:$4 sm:$0xff]  }
 0x26c   :  { %1478 = vmatpush1.bf16.msra.mxu0 %v3603_v31  ;;  %1509 = vmatprep.mubr.bf16.mxu0 %v3542_v0  ;;  %v3281_v31 = vld [vmem:[#allocation10 + $0xb0] ss:$12 sps:$4 sm:$0xff]  }
 0x26d   :  { %1479 = vmatprep.subr.bf16.mxu0 %v3606_v37  ;;  %3104 = vmatprep.mubr.msk.bf16.mxu1 %vm3544_vm0, %v3543_v59  ;;  %v3282_v37 = vld [vmem:[#allocation10 + $0x98] ss:$12 sps:$4 sm:$0xff]  }
 0x26e   :  { %3089 = vmatpush3.bf16.msra.mxu1 %v3281_v31  ;;  %v3304_v31 = vld [vmem:[#allocation10 + $0x68] ss:$12 sps:$4 sm:$0xff]  }
 0x26f   :  { %3090 = vmatprep.subr.bf16.mxu1 %v3543_v59 }
 0x270   :  { %1480 = vmatpush1.bf16.msra.mxu0 %v3608_v38  ;;  %v3283_v38 = vld [vmem:[#allocation10 + $0x80] ss:$12 sps:$4 sm:$0xff]  }
 0x271   :  { %1481 = vmatprep.subr.bf16.mxu0 %v3610_v41  ;;  %v3284_v41 = vld [vmem:[#allocation10 + $0x68] ss:$12 sps:$4 sm:$0xff]  }
 0x272   :  { %3091 = vmatpush3.bf16.msra.mxu1 %v3282_v37  ;;  %v3857_v37 = vld [vmem:[#allocation10 + $0x4c] ss:$12 sps:$4 sm:$0xff]  }
 0x273   :  { %3092 = vmatprep.subr.bf16.mxu1 %v3543_v59 }
 0x274   :  { %1482 = vmatpush1.bf16.msra.mxu0 %v3616_v48  ;;  %v3285_v48 = vld [vmem:[#allocation10 + $0x50] ss:$12 sps:$4 sm:$0xff]  }
 0x275   :  { %1483 = vmatprep.subr.bf16.mxu0 %v3619_v51  ;;  %v3286_v51 = vld [vmem:[#allocation10 + $0x38] ss:$12 sps:$4 sm:$0xff]  }
 0x276   :  { %3093 = vmatpush3.bf16.msra.mxu1 %v3283_v38  ;;  %v3860_v38 = vld [vmem:[#allocation10 + $0x48] ss:$12 sps:$4 sm:$0xff]  }
 0x277   :  { %3094 = vmatprep.subr.bf16.mxu1 %v3543_v59 }
 0x278   :  { %1484 = vmatpush1.bf16.msra.mxu0 %v3621_v52  ;;  %v3287_v52 = vld [vmem:[#allocation10 + $0x20] ss:$12 sps:$4 sm:$0xff]  }
 0x279   :  { %1485 = vmatprep.subr.bf16.mxu0 %v3623_v57  ;;  %v3288_v57 = vld [vmem:[#allocation10 + $0x8] ss:$12 sps:$4 sm:$0xff]  }
 0x27a   :  { %3095 = vmatpush3.bf16.msra.mxu1 %v3284_v41  ;;  %v3308_v41 = vld [vmem:[#allocation10 + $0x50] ss:$12 sps:$4 sm:$0xff]  }
 0x27b   :  { %3096 = vmatprep.subr.bf16.mxu1 %v3543_v59 }
 0x27c   :  { %1486 = vmatpush1.bf16.msra.mxu0 %v3629_v62 }
 0x27d   :  { %1487 = vmatprep.subr.bf16.mxu0 %v3631_v63 }
 0x27e   :  { %3097 = vmatpush3.bf16.msra.mxu1 %v3285_v48  ;;  %v3864_v48 = vld [vmem:[#allocation10 + $0x34] ss:$12 sps:$4 sm:$0xff]  }
 0x27f   :  { %3098 = vmatprep.subr.bf16.mxu1 %v3543_v59 }
 0x280   :  { %1488 = vmatpush1.bf16.msra.mxu0 %v3636_v4 }
 0x281   :  { %1489 = vmatprep.subr.bf16.mxu0 %v3638_v6 }
 0x282   :  { %3099 = vmatpush3.bf16.msra.mxu1 %v3286_v51  ;;  %v3867_v51 = vld [vmem:[#allocation10 + $0x30] ss:$12 sps:$4 sm:$0xff]  }
 0x283   :  { %3100 = vmatprep.subr.bf16.mxu1 %v3543_v59 }
 0x284   :  { %1490 = vmatpush1.bf16.msra.mxu0 %v3644_v8 }
 0x285   :  { %1491 = vmatprep.subr.bf16.mxu0 %v3648_v9 }
 0x286   :  { %3101 = vmatpush3.bf16.msra.mxu1 %v3287_v52  ;;  %v3312_v52 = vld [vmem:[#allocation10 + $0x38] ss:$12 sps:$4 sm:$0xff]  }
 0x287   :  { %3102 = vmatprep.subr.bf16.mxu1 %v3543_v59 }
 0x288   :  { %1492 = vmatpush1.bf16.msra.mxu0 %v3653_v11 }
 0x28a   :  { %3103 = vmatpush3.bf16.msra.mxu1 %v3288_v57  ;;  %v3871_v57 = vld [vmem:[#allocation10 + $0x1c] ss:$12 sps:$4 sm:$0xff]  }
 0x28b   :  { %3108 = vmatprep.subr.bf16.mxu1 %v3543_v59 }
 0x32b   :  { %v1241_v62 = vpop.f32.mrf.mxu0  ;;  %v1282_v63 = vpop.f32.mrf.mxu1 }
 0x32c   :  { %v1288_v4 = vadd.f32 %v1241_v62, %v3701_v45  ;;  %v1302_v35 = vadd.f32 %v3749_v33, %v1282_v63  ;;  %v3874_v62 = vld [vmem:[#allocation10 + $0x18] ss:$12 sps:$4 sm:$0xff]   ;;  %v3316_v63 = vld [vmem:[#allocation10 + $0x20] ss:$12 sps:$4 sm:$0xff]  }
 0x32d   :  { %v1243_v6 = vpop.f32.mrf.mxu0  ;;  %v3086_v8 = vpop.f32.mrf.mxu1 }
 0x32e   :  { %v2788_v9 = vmul.f32 -1.442695, %v1288_v4  ;;  %v1295_v23 = vadd.f32 %v1243_v6, %v3703_v49  ;;  %v3878_v4 = vld [vmem:[#allocation10 + $0x4] ss:$12 sps:$4 sm:$0xff]   ;;  %v3881_v6 = vld [vmem:[#allocation10] ss:$12 sps:$4 sm:$0xff]  }
 0x32f   :  { %v1245_v11 = vpop.f32.mrf.mxu0  ;;  %v1285_v5 = vpop.f32.mrf.mxu1  ;;  %v3320_v8 = vld [vmem:[#allocation10 + $0x8] ss:$12 sps:$4 sm:$0xff]  }
 0x330   :  { %3365 = vpow2.f32 %v2788_v9  ;;  %v2789_v27 = vmul.f32 -1.442695, %v1295_v23 }
 0x331   :  { %v1246_v1 = vpop.f32.mrf.mxu0  ;;  %v3087_v22 = vpop.f32.mrf.mxu1 }
 0x332   :  { %3367 = vpow2.f32 %v2789_v27 }
 0x33d   :  { %v3366_v26 = vpop.eup %3365 }
 0x33e   :  { %v1292_v32 = vadd.f32 1.0, %v3366_v26 }
 0x33f   :  { %v3368_v36 = vpop.eup %3367 }
 0x340   :  { %3369 = vrcp.f32 %v1292_v32  ;;  %v1299_v29 = vadd.f32 1.0, %v3368_v36 }
 0x342   :  { %3371 = vrcp.f32 %v1299_v29 }
 0x34d   :  { %v3370_v45 = vpop.eup %3369 }
 0x34e   :  { %v1303_v40 = vmul.f32 %v3370_v45, %v1302_v35 }
 0x34f   :  { %v3372_v47 = vpop.eup %3371 }
 0x350   :  { %v1304_v46 = vadd.f32 %v1303_v40, %v3706_v50  ;;  %v1306_v53 = vsub.f32 1.0, %v3372_v47  ;;  %v1308_v49 = vmul.f32 %v3372_v47, %v3789_v18  ;;  %v3831_v50 = vld [vmem:[#allocation10 + $0xac] ss:$12 sps:$4 sm:$0xff]   ;;  %v3851_v18 = vld [vmem:[#allocation10 + $0x64] ss:$12 sps:$4 sm:$0xff]  }
 0x351   :  { %1747 = vmatprep.subr.bf16.mxu0 %v3831_v50 }
 0x352   :  { %3373 = vtanh.f32 %v1304_v46 }
 0x35f   :  { %v3374_v56 = vpop.eup %3373 }
 0x360   :  { %v1307_v58 = vmul.f32 %v3374_v56, %v1306_v53 }
 0x362   :  { %v3824_v2 = vadd.f32 %v1308_v49, %v1307_v58 }
 0x364   :  { %v1310_v43 = vpack.c.bf16 %v3824_v2, %v3824_v2 }
 0x366   :  { %1312 = vst [vmem:[#allocation12 + $0x8] sm:$0xf] %v1310_v43  ;;  %1510 = vmatmul.mubr.bf16.vlgmr.msra.gmra.mxu0 %v1310_v43  ;;  %3105 = vmatmul.mubr.bf16.vlgmr.msra.gmra.mxu1 %v1310_v43 }
 0x367   :  { %1779 = vmatprep.mubr.bf16.mxu0 %v3542_v0  ;;  %3124 = vmatprep.mubr.msk.bf16.mxu1 %vm3544_vm0, %v3543_v59 }
 0x368   :  { %1748 = vmatpush1.bf16.msra.mxu0 %v3833_v39  ;;  %3109 = vmatpush3.bf16.msra.mxu1 %v3292_v54 }
 0x369   :  { %3110 = vmatprep.subr.bf16.mxu1 %v3543_v59  ;;  %1749 = vmatprep.subr.bf16.mxu0 %v3837_v7 }
 0x36c   :  { %1750 = vmatpush1.bf16.msra.mxu0 %v3840_v10  ;;  %3111 = vmatpush3.bf16.msra.mxu1 %v3296_v14 }
 0x36d   :  { %3112 = vmatprep.subr.bf16.mxu1 %v3543_v59  ;;  %1751 = vmatprep.subr.bf16.mxu0 %v3844_v15 }
 0x370   :  { %1752 = vmatpush1.bf16.msra.mxu0 %v3847_v30  ;;  %3113 = vmatpush3.bf16.msra.mxu1 %v3300_v42 }
 0x371   :  { %3114 = vmatprep.subr.bf16.mxu1 %v3543_v59  ;;  %1753 = vmatprep.subr.bf16.mxu0 %v3851_v18 }
 0x374   :  { %1754 = vmatpush1.bf16.msra.mxu0 %v3854_v19  ;;  %3115 = vmatpush3.bf16.msra.mxu1 %v3304_v31 }
 0x375   :  { %1755 = vmatprep.subr.bf16.mxu0 %v3857_v37  ;;  %3116 = vmatprep.subr.bf16.mxu1 %v3543_v59 }
 0x378   :  { %1756 = vmatpush1.bf16.msra.mxu0 %v3860_v38  ;;  %3117 = vmatpush3.bf16.msra.mxu1 %v3308_v41  ;;  %v3323_v41 = vld [vmem:[#allocation10 + $0x80] ss:$12 sps:$4 sm:$0xff]  }
 0x379   :  { %1757 = vmatprep.subr.bf16.mxu0 %v3864_v48  ;;  %3118 = vmatprep.subr.bf16.mxu1 %v3543_v59 }
 0x37c   :  { %1758 = vmatpush1.bf16.msra.mxu0 %v3867_v51  ;;  %3119 = vmatpush3.bf16.msra.mxu1 %v3312_v52  ;;  %v3324_v52 = vld [vmem:[#allocation10 + $0x68] ss:$12 sps:$4 sm:$0xff]  }
 0x37d   :  { %1759 = vmatprep.subr.bf16.mxu0 %v3871_v57  ;;  %3120 = vmatprep.subr.bf16.mxu1 %v3543_v59 }
 0x380   :  { %1760 = vmatpush1.bf16.msra.mxu0 %v3874_v62  ;;  %3121 = vmatpush3.bf16.msra.mxu1 %v3316_v63  ;;  %v3325_v63 = vld [vmem:[#allocation10 + $0x50] ss:$12 sps:$4 sm:$0xff]  }
 0x381   :  { %1761 = vmatprep.subr.bf16.mxu0 %v3878_v4  ;;  %3122 = vmatprep.subr.bf16.mxu1 %v3543_v59 }
 0x384   :  { %1762 = vmatpush1.bf16.msra.mxu0 %v3881_v6  ;;  %3123 = vmatpush3.bf16.msra.mxu1 %v3320_v8  ;;  %v3326_v8 = vld [vmem:[#allocation10 + $0x38] ss:$12 sps:$4 sm:$0xff]  }
 0x385   :  { %2017 = vmatprep.subr.bf16.mxu0 %v3831_v50  ;;  %3128 = vmatprep.subr.bf16.mxu1 %v3543_v59 }
 0x426   :  { %v1511_v9 = vpop.f32.mrf.mxu0  ;;  %v1552_v11 = vpop.f32.mrf.mxu1 }
 0x427   :  { %v1558_v5 = vadd.f32 %v1511_v9, %v3708_v55  ;;  %v1572_v53 = vadd.f32 %v3749_v33, %v1552_v11  ;;  %v3327_v9 = vld [vmem:[#allocation10 + $0x20] ss:$12 sps:$4 sm:$0xff]   ;;  %v3328_v11 = vld [vmem:[#allocation10 + $0x8] ss:$12 sps:$4 sm:$0xff]  }
 0x428   :  { %v1513_v1 = vpop.f32.mrf.mxu0  ;;  %v3106_v22 = vpop.f32.mrf.mxu1 }
 0x429   :  { %v2814_v23 = vmul.f32 -1.442695, %v1558_v5  ;;  %v1565_v29 = vadd.f32 %v1513_v1, %v3710_v60 }
 0x42a   :  { %v1515_v27 = vpop.f32.mrf.mxu0  ;;  %v1555_v26 = vpop.f32.mrf.mxu1 }
 0x42b   :  { %3375 = vpow2.f32 %v2814_v23  ;;  %v2815_v35 = vmul.f32 -1.442695, %v1565_v29 }
 0x42c   :  { %v1516_v32 = vpop.f32.mrf.mxu0  ;;  %v3107_v36 = vpop.f32.mrf.mxu1 }
 0x42d   :  { %3377 = vpow2.f32 %v2815_v35 }
 0x438   :  { %v3376_v45 = vpop.eup %3375 }
 0x439   :  { %v1562_v40 = vadd.f32 1.0, %v3376_v45 }
 0x43a   :  { %v3378_v46 = vpop.eup %3377 }
 0x43b   :  { %3379 = vrcp.f32 %v1562_v40  ;;  %v1569_v47 = vadd.f32 1.0, %v3378_v46 }
 0x43d   :  { %3381 = vrcp.f32 %v1569_v47 }
 0x448   :  { %v3380_v55 = vpop.eup %3379 }
 0x449   :  { %v1573_v56 = vmul.f32 %v3380_v55, %v1572_v53 }
 0x44a   :  { %v3382_v49 = vpop.eup %3381 }
 0x44b   :  { %v1574_v58 = vadd.f32 %v1573_v56, %v3713_v61  ;;  %v1576_v43 = vsub.f32 1.0, %v3382_v49  ;;  %v1578_v60 = vmul.f32 %v3382_v49, %v3824_v2  ;;  %v3321_v61 = vld [vmem:[#allocation10 + $0xb0] ss:$12 sps:$4 sm:$0xff]   ;;  %v3322_v2 = vld [vmem:[#allocation10 + $0x98] ss:$12 sps:$4 sm:$0xff]  }
 0x44d   :  { %3383 = vtanh.f32 %v1574_v58 }
 0x45a   :  { %v3384_v54 = vpop.eup %3383 }
 0x45b   :  { %v1577_v14 = vmul.f32 %v3384_v54, %v1576_v43 }
 0x45d   :  { %v3893_v42 = vadd.f32 %v1578_v60, %v1577_v14 }
 0x45f   :  { %v1580_v31 = vpack.c.bf16 %v3893_v42, %v3893_v42 }
 0x461   :  { %1582 = vst [vmem:[#allocation12 + $0xc] sm:$0xf] %v1580_v31  ;;  %1780 = vmatmul.mubr.bf16.vlgmr.msra.gmra.mxu0 %v1580_v31  ;;  %3125 = vmatmul.mubr.bf16.vlgmr.msra.gmra.mxu1 %v1580_v31 }
 0x462   :  { %2018 = vmatpush1.bf16.msra.mxu0 %v3833_v39  ;;  %2049 = vmatprep.mubr.bf16.mxu0 %v3542_v0 }
 0x463   :  { %2019 = vmatprep.subr.bf16.mxu0 %v3837_v7  ;;  %3144 = vmatprep.mubr.msk.bf16.mxu1 %vm3544_vm0, %v3543_v59 }
 0x464   :  { %3129 = vmatpush3.bf16.msra.mxu1 %v3321_v61 }
 0x465   :  { %3130 = vmatprep.subr.bf16.mxu1 %v3543_v59 }
 0x466   :  { %2020 = vmatpush1.bf16.msra.mxu0 %v3840_v10 }
 0x467   :  { %2021 = vmatprep.subr.bf16.mxu0 %v3844_v15 }
 0x468   :  { %3131 = vmatpush3.bf16.msra.mxu1 %v3322_v2  ;;  %v3331_v2 = vld [vmem:[#allocation10 + $0x80] ss:$12 sps:$4 sm:$0xff]  }
 0x469   :  { %3132 = vmatprep.subr.bf16.mxu1 %v3543_v59 }
 0x46a   :  { %2022 = vmatpush1.bf16.msra.mxu0 %v3847_v30 }
 0x46b   :  { %2023 = vmatprep.subr.bf16.mxu0 %v3851_v18 }
 0x46c   :  { %3133 = vmatpush3.bf16.msra.mxu1 %v3323_v41  ;;  %v3332_v41 = vld [vmem:[#allocation10 + $0x68] ss:$12 sps:$4 sm:$0xff]  }
 0x46d   :  { %3134 = vmatprep.subr.bf16.mxu1 %v3543_v59 }
 0x46e   :  { %2024 = vmatpush1.bf16.msra.mxu0 %v3854_v19 }
 0x46f   :  { %2025 = vmatprep.subr.bf16.mxu0 %v3857_v37 }
 0x470   :  { %3135 = vmatpush3.bf16.msra.mxu1 %v3324_v52  ;;  %v3333_v52 = vld [vmem:[#allocation10 + $0x50] ss:$12 sps:$4 sm:$0xff]  }
 0x471   :  { %3136 = vmatprep.subr.bf16.mxu1 %v3543_v59 }
 0x472   :  { %2026 = vmatpush1.bf16.msra.mxu0 %v3860_v38 }
 0x473   :  { %2027 = vmatprep.subr.bf16.mxu0 %v3864_v48 }
 0x474   :  { %3137 = vmatpush3.bf16.msra.mxu1 %v3325_v63  ;;  %v3334_v63 = vld [vmem:[#allocation10 + $0x38] ss:$12 sps:$4 sm:$0xff]  }
 0x475   :  { %3138 = vmatprep.subr.bf16.mxu1 %v3543_v59 }
 0x476   :  { %2028 = vmatpush1.bf16.msra.mxu0 %v3867_v51 }
 0x477   :  { %2029 = vmatprep.subr.bf16.mxu0 %v3871_v57 }
 0x478   :  { %3139 = vmatpush3.bf16.msra.mxu1 %v3326_v8  ;;  %v3336_v8 = vld [vmem:[#allocation10 + $0x8] ss:$12 sps:$4 sm:$0xff]  }
 0x479   :  { %3140 = vmatprep.subr.bf16.mxu1 %v3543_v59 }
 0x47a   :  { %2030 = vmatpush1.bf16.msra.mxu0 %v3874_v62 }
 0x47b   :  { %2031 = vmatprep.subr.bf16.mxu0 %v3878_v4 }
 0x47c   :  { %3141 = vmatpush3.bf16.msra.mxu1 %v3327_v9 }
 0x47d   :  { %3142 = vmatprep.subr.bf16.mxu1 %v3543_v59 }
 0x47e   :  { %2032 = vmatpush1.bf16.msra.mxu0 %v3881_v6 }
 0x47f   :  { %2287 = vmatprep.subr.bf16.mxu0 %v3831_v50 }
 0x480   :  { %3143 = vmatpush3.bf16.msra.mxu1 %v3328_v11 }
 0x481   :  { %3148 = vmatprep.subr.bf16.mxu1 %v3543_v59 }
 0x521   :  { %v1781_v5 = vpop.f32.mrf.mxu0  ;;  %v1822_v1 = vpop.f32.mrf.mxu1 }
 0x522   :  { %v1828_v22 = vadd.f32 %v1781_v5, %v3715_v3  ;;  %v1842_v56 = vadd.f32 %v3749_v33, %v1822_v1 }
 0x523   :  { %v1783_v23 = vpop.f32.mrf.mxu0  ;;  %v3126_v27 = vpop.f32.mrf.mxu1 }
 0x524   :  { %v2840_v26 = vmul.f32 -1.442695, %v1828_v22  ;;  %v1835_v45 = vadd.f32 %v1783_v23, %v3720_v12 }
 0x525   :  { %v1785_v32 = vpop.f32.mrf.mxu0  ;;  %v1825_v36 = vpop.f32.mrf.mxu1 }
 0x526   :  { %3385 = vpow2.f32 %v2840_v26  ;;  %v2841_v40 = vmul.f32 -1.442695, %v1835_v45 }
 0x527   :  { %v1786_v29 = vpop.f32.mrf.mxu0  ;;  %v3127_v35 = vpop.f32.mrf.mxu1 }
 0x528   :  { %3387 = vpow2.f32 %v2841_v40 }
 0x533   :  { %v3386_v46 = vpop.eup %3385 }
 0x534   :  { %v1832_v47 = vadd.f32 1.0, %v3386_v46 }
 0x535   :  { %v3388_v53 = vpop.eup %3387 }
 0x536   :  { %3389 = vrcp.f32 %v1832_v47  ;;  %v1839_v55 = vadd.f32 1.0, %v3388_v53 }
 0x538   :  { %3391 = vrcp.f32 %v1839_v55 }
 0x543   :  { %v3390_v3 = vpop.eup %3389 }
 0x544   :  { %v1843_v58 = vmul.f32 %v3390_v3, %v1842_v56 }
 0x545   :  { %v3392_v43 = vpop.eup %3391 }
 0x546   :  { %v1844_v49 = vadd.f32 %v1843_v58, %v3728_v17  ;;  %v1846_v54 = vsub.f32 1.0, %v3392_v43  ;;  %v1848_v12 = vmul.f32 %v3392_v43, %v3893_v42  ;;  %v3329_v17 = vld [vmem:[#allocation10 + $0xb0] ss:$12 sps:$4 sm:$0xff]   ;;  %v3330_v42 = vld [vmem:[#allocation10 + $0x98] ss:$12 sps:$4 sm:$0xff]  }
 0x548   :  { %3393 = vtanh.f32 %v1844_v49 }
 0x555   :  { %v3394_v14 = vpop.eup %3393 }
 0x556   :  { %v1847_v60 = vmul.f32 %v3394_v14, %v1846_v54 }
 0x558   :  { %v3929_v31 = vadd.f32 %v1848_v12, %v1847_v60 }
 0x55a   :  { %v1850_v61 = vpack.c.bf16 %v3929_v31, %v3929_v31 }
 0x55c   :  { %1852 = vst [vmem:[#allocation12 + $0x10] sm:$0xf] %v1850_v61  ;;  %2050 = vmatmul.mubr.bf16.vlgmr.msra.gmra.mxu0 %v1850_v61  ;;  %3145 = vmatmul.mubr.bf16.vlgmr.msra.gmra.mxu1 %v1850_v61 }
 0x55d   :  { %2288 = vmatpush1.bf16.msra.mxu0 %v3833_v39  ;;  %2319 = vmatprep.mubr.bf16.mxu0 %v3542_v0 }
 0x55e   :  { %2289 = vmatprep.subr.bf16.mxu0 %v3837_v7  ;;  %3164 = vmatprep.mubr.msk.bf16.mxu1 %vm3544_vm0, %v3543_v59 }
 0x55f   :  { %3149 = vmatpush3.bf16.msra.mxu1 %v3329_v17 }
 0x560   :  { %3150 = vmatprep.subr.bf16.mxu1 %v3543_v59 }
 0x561   :  { %2290 = vmatpush1.bf16.msra.mxu0 %v3840_v10 }
 0x562   :  { %2291 = vmatprep.subr.bf16.mxu0 %v3844_v15 }
 0x563   :  { %3151 = vmatpush3.bf16.msra.mxu1 %v3330_v42 }
 0x564   :  { %3152 = vmatprep.subr.bf16.mxu1 %v3543_v59 }
 0x565   :  { %2292 = vmatpush1.bf16.msra.mxu0 %v3847_v30 }
 0x566   :  { %2293 = vmatprep.subr.bf16.mxu0 %v3851_v18 }
 0x567   :  { %3153 = vmatpush3.bf16.msra.mxu1 %v3331_v2 }
 0x568   :  { %3154 = vmatprep.subr.bf16.mxu1 %v3543_v59 }
 0x569   :  { %2294 = vmatpush1.bf16.msra.mxu0 %v3854_v19 }
 0x56a   :  { %2295 = vmatprep.subr.bf16.mxu0 %v3857_v37 }
 0x56b   :  { %3155 = vmatpush3.bf16.msra.mxu1 %v3332_v41 }
 0x56c   :  { %3156 = vmatprep.subr.bf16.mxu1 %v3543_v59 }
 0x56d   :  { %2296 = vmatpush1.bf16.msra.mxu0 %v3860_v38 }
 0x56e   :  { %2297 = vmatprep.subr.bf16.mxu0 %v3864_v48 }
 0x56f   :  { %3157 = vmatpush3.bf16.msra.mxu1 %v3333_v52 }
 0x570   :  { %3158 = vmatprep.subr.bf16.mxu1 %v3543_v59 }
 0x571   :  { %2298 = vmatpush1.bf16.msra.mxu0 %v3867_v51 }
 0x572   :  { %2299 = vmatprep.subr.bf16.mxu0 %v3871_v57 }
 0x573   :  { %3159 = vmatpush3.bf16.msra.mxu1 %v3334_v63 }
 0x574   :  { %3160 = vmatprep.subr.bf16.mxu1 %v3543_v59 }
 0x575   :  { %2300 = vmatpush1.bf16.msra.mxu0 %v3874_v62 }
 0x576   :  { %2301 = vmatprep.subr.bf16.mxu0 %v3878_v4 }
 0x579   :  { %2302 = vmatpush1.bf16.msra.mxu0 %v3881_v6 }
 0x57a   :  { %2557 = vmatprep.subr.bf16.mxu0 %v3831_v50  ;;  %v3335_v50 = vld [vmem:[#allocation10 + $0x20] ss:$12 sps:$4 sm:$0xff]  }
 0x57b   :  { %3161 = vmatpush3.bf16.msra.mxu1 %v3335_v50 }
 0x57c   :  { %3162 = vmatprep.subr.bf16.mxu1 %v3543_v59 }
 0x57f   :  { %3163 = vmatpush3.bf16.msra.mxu1 %v3336_v8 }
 0x580   :  { %3168 = vmatprep.subr.bf16.mxu1 %v3543_v59 }
 0x61c   :  { %v2051_v9 = vpop.f32.mrf.mxu0  ;;  %v2092_v11 = vpop.f32.mrf.mxu1 }
 0x61d   :  { %v2098_v5 = vadd.f32 %v2051_v9, %v3725_v16  ;;  %v2112_v53 = vadd.f32 %v3749_v33, %v2092_v11 }
 0x61e   :  { %v2053_v1 = vpop.f32.mrf.mxu0  ;;  %v3146_v22 = vpop.f32.mrf.mxu1 }
 0x61f   :  { %v2866_v23 = vmul.f32 -1.442695, %v2098_v5  ;;  %v2105_v29 = vadd.f32 %v2053_v1, %v3730_v20 }
 0x620   :  { %v2055_v27 = vpop.f32.mrf.mxu0  ;;  %v2095_v26 = vpop.f32.mrf.mxu1 }
 0x621   :  { %3395 = vpow2.f32 %v2866_v23  ;;  %v2867_v35 = vmul.f32 -1.442695, %v2105_v29 }
 0x622   :  { %v2056_v32 = vpop.f32.mrf.mxu0  ;;  %v3147_v36 = vpop.f32.mrf.mxu1 }
 0x623   :  { %3397 = vpow2.f32 %v2867_v35 }
 0x62e   :  { %v3396_v45 = vpop.eup %3395 }
 0x62f   :  { %v2102_v40 = vadd.f32 1.0, %v3396_v45 }
 0x630   :  { %v3398_v46 = vpop.eup %3397 }
 0x631   :  { %3399 = vrcp.f32 %v2102_v40  ;;  %v2109_v47 = vadd.f32 1.0, %v3398_v46 }
 0x633   :  { %3401 = vrcp.f32 %v2109_v47 }
 0x63e   :  { %v3400_v16 = vpop.eup %3399 }
 0x63f   :  { %v2113_v55 = vmul.f32 %v3400_v16, %v2112_v53 }
 0x640   :  { %v3402_v3 = vpop.eup %3401 }
 0x641   :  { %v2114_v56 = vadd.f32 %v2113_v55, %v3738_v25  ;;  %v2116_v58 = vsub.f32 1.0, %v3402_v3  ;;  %v2118_v20 = vmul.f32 %v3402_v3, %v3929_v31  ;;  %v3338_v25 = vld [vmem:[#allocation10 + $0x98] ss:$12 sps:$4 sm:$0xff]  }
 0x643   :  { %3403 = vtanh.f32 %v2114_v56 }
 0x650   :  { %v3404_v49 = vpop.eup %3403 }
 0x651   :  { %v2117_v43 = vmul.f32 %v3404_v49, %v2116_v58 }
 0x653   :  { %v3965_v54 = vadd.f32 %v2118_v20, %v2117_v43 }
 0x655   :  { %v2120_v14 = vpack.c.bf16 %v3965_v54, %v3965_v54 }
 0x657   :  { %2122 = vst [vmem:[#allocation12 + $0x14] sm:$0xf] %v2120_v14  ;;  %2320 = vmatmul.mubr.bf16.vlgmr.msra.gmra.mxu0 %v2120_v14  ;;  %3165 = vmatmul.mubr.bf16.vlgmr.msra.gmra.mxu1 %v2120_v14 }
 0x658   :  { %2558 = vmatpush1.bf16.msra.mxu0 %v3833_v39  ;;  %2589 = vmatprep.mubr.bf16.mxu0 %v3542_v0  ;;  %v3337_v0 = vld [vmem:[#allocation10 + $0xb0] ss:$12 sps:$4 sm:$0xff]   ;;  %v3339_v39 = vld [vmem:[#allocation10 + $0x80] ss:$12 sps:$4 sm:$0xff]  }
 0x659   :  { %2559 = vmatprep.subr.bf16.mxu0 %v3837_v7  ;;  %3184 = vmatprep.mubr.msk.bf16.mxu1 %vm3544_vm0, %v3543_v59  ;;  %v3340_v7 = vld [vmem:[#allocation10 + $0x68] ss:$12 sps:$4 sm:$0xff]  }
 0x65a   :  { %3169 = vmatpush3.bf16.msra.mxu1 %v3337_v0 }
 0x65b   :  { %3170 = vmatprep.subr.bf16.mxu1 %v3543_v59 }
 0x65c   :  { %2560 = vmatpush1.bf16.msra.mxu0 %v3840_v10  ;;  %v3341_v10 = vld [vmem:[#allocation10 + $0x50] ss:$12 sps:$4 sm:$0xff]  }
 0x65d   :  { %2561 = vmatprep.subr.bf16.mxu0 %v3844_v15  ;;  %v3342_v15 = vld [vmem:[#allocation10 + $0x38] ss:$12 sps:$4 sm:$0xff]  }
 0x65e   :  { %3171 = vmatpush3.bf16.msra.mxu1 %v3338_v25 }
 0x65f   :  { %3172 = vmatprep.subr.bf16.mxu1 %v3543_v59 }
 0x660   :  { %2562 = vmatpush1.bf16.msra.mxu0 %v3847_v30  ;;  %v3343_v30 = vld [vmem:[#allocation10 + $0x20] ss:$12 sps:$4 sm:$0xff]  }
 0x661   :  { %2563 = vmatprep.subr.bf16.mxu0 %v3851_v18  ;;  %v3344_v18 = vld [vmem:[#allocation10 + $0x8] ss:$12 sps:$4 sm:$0xff]  }
 0x662   :  { %3173 = vmatpush3.bf16.msra.mxu1 %v3339_v39 }
 0x663   :  { %3174 = vmatprep.subr.bf16.mxu1 %v3543_v59 }
 0x664   :  { %2564 = vmatpush1.bf16.msra.mxu0 %v3854_v19 }
 0x665   :  { %2565 = vmatprep.subr.bf16.mxu0 %v3857_v37 }
 0x666   :  { %3175 = vmatpush3.bf16.msra.mxu1 %v3340_v7 }
 0x667   :  { %3176 = vmatprep.subr.bf16.mxu1 %v3543_v59 }
 0x668   :  { %2566 = vmatpush1.bf16.msra.mxu0 %v3860_v38 }
 0x669   :  { %2567 = vmatprep.subr.bf16.mxu0 %v3864_v48 }
 0x66a   :  { %3177 = vmatpush3.bf16.msra.mxu1 %v3341_v10 }
 0x66b   :  { %3178 = vmatprep.subr.bf16.mxu1 %v3543_v59 }
 0x66c   :  { %2568 = vmatpush1.bf16.msra.mxu0 %v3867_v51 }
 0x66d   :  { %2569 = vmatprep.subr.bf16.mxu0 %v3871_v57 }
 0x66e   :  { %3179 = vmatpush3.bf16.msra.mxu1 %v3342_v15 }
 0x66f   :  { %3180 = vmatprep.subr.bf16.mxu1 %v3543_v59 }
 0x670   :  { %2570 = vmatpush1.bf16.msra.mxu0 %v3874_v62 }
 0x671   :  { %2571 = vmatprep.subr.bf16.mxu0 %v3878_v4 }
 0x672   :  { %3181 = vmatpush3.bf16.msra.mxu1 %v3343_v30 }
 0x673   :  { %3182 = vmatprep.subr.bf16.mxu1 %v3543_v59 }
 0x674   :  { %2572 = vmatpush1.bf16.msra.mxu0 %v3881_v6 }
 0x676   :  { %3183 = vmatpush3.bf16.msra.mxu1 %v3344_v18 }
 0x717   :  { %v2321_v19 = vpop.f32.mrf.mxu0  ;;  %v2362_v37 = vpop.f32.mrf.mxu1 }
 0x718   :  { %v2368_v38 = vadd.f32 %v2321_v19, %v3735_v24  ;;  %v2382_v2 = vadd.f32 %v3749_v33, %v2362_v37 }
 0x719   :  { %v2323_v48 = vpop.f32.mrf.mxu0  ;;  %v3166_v51 = vpop.f32.mrf.mxu1 }
 0x71a   :  { %v2892_v57 = vmul.f32 -1.442695, %v2368_v38  ;;  %v2375_v12 = vadd.f32 %v2323_v48, %v3740_v28 }
 0x71b   :  { %v2325_v62 = vpop.f32.mrf.mxu0  ;;  %v2365_v4 = vpop.f32.mrf.mxu1 }
 0x71c   :  { %3405 = vpow2.f32 %v2892_v57  ;;  %v2893_v31 = vmul.f32 -1.442695, %v2375_v12 }
 0x71d   :  { %v2326_v6 = vpop.f32.mrf.mxu0  ;;  %v3167_v60 = vpop.f32.mrf.mxu1 }
 0x71e   :  { %3407 = vpow2.f32 %v2893_v31 }
 0x729   :  { %v3406_v61 = vpop.eup %3405 }
 0x72a   :  { %v2372_v17 = vadd.f32 1.0, %v3406_v61 }
 0x72b   :  { %v3408_v59 = vpop.eup %3407 }
 0x72c   :  { %3409 = vrcp.f32 %v2372_v17  ;;  %v2379_v42 = vadd.f32 1.0, %v3408_v59 }
 0x72e   :  { %3411 = vrcp.f32 %v2379_v42 }
 0x739   :  { %v3410_v24 = vpop.eup %3409 }
 0x73a   :  { %v2383_v41 = vmul.f32 %v3410_v24, %v2382_v2 }
 0x73b   :  { %v3412_v63 = vpop.eup %3411 }
 0x73c   :  { %v2384_v52 = vadd.f32 %v2383_v41, %v3723_v13  ;;  %v2386_v50 = vsub.f32 1.0, %v3412_v63  ;;  %v2388_v28 = vmul.f32 %v3412_v63, %v3965_v54 }
 0x73e   :  { %3413 = vtanh.f32 %v2384_v52 }
 0x74b   :  { %v3414_v8 = vpop.eup %3413 }
 0x74c   :  { %v2387_v9 = vmul.f32 %v3414_v8, %v2386_v50 }
 0x74e   :  { %v2389_v11 = vadd.f32 %v2388_v28, %v2387_v9 }
 0x750   :  { %v2390_v5 = vpack.c.bf16 %v2389_v11, %v2389_v11 }
 0x752   :  { %2392 = vst [vmem:[#allocation12 + $0x18] sm:$0xf] %v2390_v5  ;;  %2590 = vmatmul.mubr.bf16.vlgmr.msra.gmra.mxu0 %v2390_v5  ;;  %3185 = vmatmul.mubr.bf16.vlgmr.msra.gmra.mxu1 %v2390_v5 }
 0x812   :  { %v2591_v1 = vpop.f32.mrf.mxu0  ;;  %v2632_v22 = vpop.f32.mrf.mxu1 }
 0x813   :  { %v2638_v33 = vadd.f32 %v2591_v1, %v3742_v34  ;;  %v3425_v34 = vld [vmem:[%s4016_s5] ss:$0 sm:$0xff] }
 0x814   :  { %v2593_v23 = vpop.f32.mrf.mxu0  ;;  %v3186_v27 = vpop.f32.mrf.mxu1  ;;  %v2652_v16 = vadd.f32 %v3425_v34, %v2632_v22 }
 0x815   :  { %v2918_v26 = vmul.f32 -1.442695, %v2638_v33  ;;  %v2645_v35 = vadd.f32 %v2593_v23, %v3744_v44 }
 0x816   :  { %v2595_v13 = vpop.f32.mrf.mxu0  ;;  %v2635_v32 = vpop.f32.mrf.mxu1 }
 0x817   :  { %3415 = vpow2.f32 %v2918_v26  ;;  %v2919_v45 = vmul.f32 -1.442695, %v2645_v35 }
 0x818   :  { %v2596_v36 = vpop.f32.mrf.mxu0  ;;  %v3187_v29 = vpop.f32.mrf.mxu1 }
 0x819   :  { %3417 = vpow2.f32 %v2919_v45 }
 0x824   :  { %v3416_v40 = vpop.eup %3415 }
 0x825   :  { %v2642_v46 = vadd.f32 1.0, %v3416_v40 }
 0x826   :  { %v3418_v47 = vpop.eup %3417 }
 0x827   :  { %3419 = vrcp.f32 %v2642_v46  ;;  %v2649_v53 = vadd.f32 1.0, %v3418_v47 }
 0x829   :  { %3421 = vrcp.f32 %v2649_v53 }
 0x834   :  { %v3420_v55 = vpop.eup %3419 }
 0x835   :  { %v2653_v56 = vmul.f32 %v3420_v55, %v2652_v16 }
 0x836   :  { %v3422_v58 = vpop.eup %3421 }
 0x837   :  { %v2654_v3 = vadd.f32 %v2653_v56, %v3733_v21  ;;  %v2656_v44 = vsub.f32 1.0, %v3422_v58  ;;  %v2658_v20 = vmul.f32 %v3422_v58, %v2389_v11 }
 0x839   :  { %3423 = vtanh.f32 %v2654_v3 }
 0x846   :  { %v3424_v49 = vpop.eup %3423 }
 0x847   :  { %v2657_v43 = vmul.f32 %v3424_v49, %v2656_v44 }
 0x849   :  { %v2659_v54 = vadd.f32 %v2658_v20, %v2657_v43 }
 0x84b   :  { %v2660_v14 = vpack.c.bf16 %v2659_v54, %v2659_v54 }
 0x84d   :  { %2662 = vst [vmem:[#allocation12 + $0x1c] sm:$0xf] %v2660_v14 }
 0x84e   :  { %3517 = shalt.err (!%p3514_p10)
}
 0x84f   :  { %2675 = dma.vmem_to_hbm [thread:$0]  %s2670_s23, 512, %s4017_s6, [#allocation6], %s3536_s26, %s3536_s26, %s3537_s27  }
 0x850   :  { %3532 = dma.done.wait [#allocation6], 512  }
 0x851   :  { %3533 = vsyncadd [#allocation6], 4294966784 }
 0x852   :  { %2679 = vsyncpa [#allocation5], 1 }
 0x853   :  { %2680 = vsyncpa [#allocation8], 1 }
 0x854   :  { %2681 = vsyncpa [#allocation11], 1 }
 0x855   :  { %2682 = vsyncpa [#allocation6], 1 }

</bundles_post_ra>
